<compile_context>
chip_gen: v6e
topology: v6e:2x2x1
jax: 0.10.0
libtpu: 0.0.40
codegen_flags: <defaults>
</compile_context>

<pallas_src>
import jax
import jax.numpy as jnp
from jax.experimental import pallas as pl
from jax.experimental.pallas import tpu as pltpu

EPS = 1e-5


def _round_up(n, m):
    return ((n + m - 1) // m) * m


def _bn_relu_bf16(z, gamma, beta):
    """Train-mode BatchNorm1d + ReLU, fused, bf16 out.

    z: [B, H] fp32 (pre-BN linear output; the linear bias is omitted -- it
    cancels under train-mode BN). Column sums are done on the MXU (idle here),
    variance is centered (two-pass) for numerical robustness, rsqrt goes to
    the EUP, and the normalize+ReLU+bf16-cast is a single fused VPU pass.
    """
    b = z.shape[0]
    inv_b = 1.0 / b                                   # static
    ones = jnp.ones((8, b), jnp.float32)              # MXU-friendly LHS (8 sublanes)
    mean = jnp.dot(ones, z, preferred_element_type=jnp.float32)[0:1] * inv_b
    c = z - mean
    var = jnp.dot(ones, c * c, preferred_element_type=jnp.float32)[0:1] * inv_b
    scale = gamma * jax.lax.rsqrt(var + EPS)          # EUP
    return jnp.maximum(c * scale + beta, 0.0).astype(jnp.bfloat16)


def classifier_kernel(x_ref, vecs_ref, w1_ref, w2_ref, w3_ref, out_ref, xpad_ref):
    """One grid step = one mini-batch forward. Weights are VMEM-resident."""
    in_dim = x_ref.shape[-1]
    out_pad = out_ref.shape[-1]

    # In-kernel zero-pad of the contraction dim (e.g. 429 -> 512) + bf16 cast.
    # (Zero the whole scratch every step: with a "parallel" batch axis a core
    # may never see program_id==0, so a one-time init is not safe; the zero
    # store is only a handful of vregs.)
    xpad_ref[...] = jnp.zeros_like(xpad_ref)
    xpad_ref[:, :in_dim] = x_ref[0].astype(jnp.bfloat16)

    # Packed per-feature vectors: rows 0..3 = gamma1, beta1, gamma2, beta2;
    # row 4 = head bias (lane-padded).
    g1, be1 = vecs_ref[0:1, :], vecs_ref[1:2, :]
    g2, be2 = vecs_ref[2:3, :], vecs_ref[3:4, :]
    b3 = vecs_ref[4:5, :out_pad]

    # Block 1: Linear(in_pad, H) (bias cancels) + BN + ReLU  -> bf16
    z1 = jnp.dot(xpad_ref[...], w1_ref[...], preferred_element_type=jnp.float32)
    h1 = _bn_relu_bf16(z1, g1, be1)

    # Block 2: Linear(H, H) (bias cancels) + BN + ReLU        -> bf16
    z2 = jnp.dot(h1, w2_ref[...], preferred_element_type=jnp.float32)
    h2 = _bn_relu_bf16(z2, g2, be2)

    # Output head: Linear(H, out_pad) with bias (lane-padded to 128).
    out_ref[0] = (
        jnp.dot(h2, w3_ref[...], preferred_element_type=jnp.float32) + b3
    )


def classifier_forward(x, params):
    """Forward pass.

    x: [NB, B, input_dim] (bf16 preferred; fp32 also accepted) — NB independent
       mini-batches (BN stats are per mini-batch, matching one nn.Module
       forward() call per mini-batch). A 2-D [B, input_dim] input is treated
       as NB=1.
    Returns lane-padded fp32 logits [NB, B, out_pad] (or [B, out_pad]).
    Padded logit columns are exactly zero; slice/mask them downstream.
    """
    vecs, w1, w2, w3 = params
    squeeze = x.ndim == 2
    if squeeze:
        x = x[None]
    nb, bsz, in_dim = x.shape
    in_pad, hidden = w1.shape
    out_pad = w3.shape[1]
    assert in_dim <= in_pad and out_pad <= hidden

    operands = (x, vecs, w1, w2, w3)

    # --- advisory cost estimate for XLA scheduling around the call ---
    itemsize = jnp.dtype(x.dtype).itemsize
    flops = 2 * nb * bsz * (in_pad * hidden + hidden * hidden + hidden * out_pad)
    flops += nb * 4 * 2 * 8 * bsz * hidden            # MXU-based BN stat sums
    weight_bytes = (w1.size + w2.size + w3.size) * 2 + vecs.size * 4
    bytes_accessed = int(x.size * itemsize + weight_bytes + nb * bsz * out_pad * 4)
    cost = pl.CostEstimate(flops=int(flops), transcendentals=nb * 2 * hidden,
                           bytes_accessed=bytes_accessed)

    # --- right-sized VMEM limit: footprint(B) + generous headroom ---
    footprint = (
        2 * weight_bytes                               # weights (double-buffered)
        + 2 * bsz * in_dim * itemsize                  # x block, double-buffered
        + 2 * bsz * out_pad * 4                        # out block, double-buffered
        + bsz * in_pad * 2                             # bf16 pad scratch
        + 8 * bsz * hidden * 4                         # live fp32 intermediates
    )
    vmem_limit = int(min(max(2 * footprint, 4 << 20), 64 << 20))

    grid_spec = pltpu.PrefetchScalarGridSpec(
        num_scalar_prefetch=0,
        grid=(nb,),
        in_specs=[
            pl.BlockSpec((1, bsz, in_dim), lambda i: (i, 0, 0)),
            pl.BlockSpec((8, hidden), lambda i: (0, 0)),        # resident
            pl.BlockSpec((in_pad, hidden), lambda i: (0, 0)),   # resident
            pl.BlockSpec((hidden, hidden), lambda i: (0, 0)),   # resident
            pl.BlockSpec((hidden, out_pad), lambda i: (0, 0)),  # resident
        ],
        out_specs=pl.BlockSpec((1, bsz, out_pad), lambda i: (i, 0, 0)),
        scratch_shapes=[pltpu.VMEM((bsz, in_pad), jnp.bfloat16)],
    )

    out = pl.pallas_call(
        classifier_kernel,
        out_shape=jax.ShapeDtypeStruct((nb, bsz, out_pad), jnp.float32),
        grid_spec=grid_spec,
        cost_estimate=cost,
        compiler_params=pltpu.CompilerParams(
            dimension_semantics=("parallel",),
            vmem_limit_bytes=vmem_limit,
        ),
    )(*operands)

    return out[0] if squeeze else out


def init_params(key, input_dim, hidden_dim, output_dim, *, in_pad, out_pad):
    """PyTorch-style init (uniform +-1/sqrt(fan_in); BN gamma=1, beta=0).

    Weights are stored bf16 for the MXU (the reference shares them, so the
    bf16-vs-fp32 divergence from the PyTorch fp32 model is a stated tradeoff).
    Returns (kernel_params, ref_biases): pre-BN biases b1/b2 are not kernel
    params (they cancel under train-mode BN) but are returned so the reference
    can prove the equivalence.
    """
    assert output_dim <= out_pad <= hidden_dim
    ks = jax.random.split(key, 6)

    def lin(kw, kb, fan_in, fan_out):
        bound = 1.0 / jnp.sqrt(jnp.float32(fan_in))
        w = jax.random.uniform(kw, (fan_in, fan_out), jnp.float32, -bound, bound)
        b = jax.random.uniform(kb, (1, fan_out), jnp.float32, -bound, bound)
        return w, b

    w1, b1 = lin(ks[0], ks[1], input_dim, hidden_dim)
    w1p = (jnp.zeros((in_pad, hidden_dim), jnp.float32)
           .at[:input_dim, :].set(w1).astype(jnp.bfloat16))

    w2, b2 = lin(ks[2], ks[3], hidden_dim, hidden_dim)
    w2b = w2.astype(jnp.bfloat16)

    w3, b3 = lin(ks[4], ks[5], hidden_dim, output_dim)
    w3p = (jnp.zeros((hidden_dim, out_pad), jnp.float32)
           .at[:, :output_dim].set(w3).astype(jnp.bfloat16))

    # Pack gamma1, beta1, gamma2, beta2, head-bias into one sublane-aligned
    # [8, H] fp32 array (single DMA / single 8 KiB VMEM tile).
    vecs = jnp.zeros((8, hidden_dim), jnp.float32)
    vecs = vecs.at[0].set(1.0)                       # gamma1
    vecs = vecs.at[2].set(1.0)                       # gamma2 (rows 1,3: beta=0)
    vecs = vecs.at[4, :output_dim].set(b3[0])        # head bias, lane-padded

    kernel_params = (vecs, w1p, w2b, w3p)
    ref_biases = (b1, b2)
    return kernel_params, ref_biases


def reference_forward_one(x, kernel_params, ref_biases):
    """Pure-JAX reference for ONE mini-batch, matching the PyTorch forward
    (train-mode BN), *including* the pre-BN linear biases, with bf16 matmuls
    and fp32 accumulation."""
    vecs, w1, w2, w3 = kernel_params
    b1, b2 = ref_biases
    in_pad = w1.shape[0]
    out_pad = w3.shape[1]
    g1, be1 = vecs[0:1], vecs[1:2]
    g2, be2 = vecs[2:3], vecs[3:4]
    b3 = vecs[4:5, :out_pad]

    xp = jnp.pad(x.astype(jnp.bfloat16), ((0, 0), (0, in_pad - x.shape[1])))

    def dot_bf16(a, w):
        return jnp.dot(a.astype(jnp.bfloat16), w,
                       preferred_element_type=jnp.float32)

    def bn_relu(z, g, be):
        m = jnp.mean(z, axis=0, keepdims=True)
        v = jnp.mean((z - m) ** 2, axis=0, keepdims=True)
        return jnp.maximum((z - m) / jnp.sqrt(v + EPS) * g + be, 0.0)

    h = bn_relu(dot_bf16(xp, w1) + b1, g1, be1)
    h = bn_relu(dot_bf16(h, w2) + b2, g2, be2)
    return dot_bf16(h, w3) + b3


if __name__ == "__main__":
    # Small, module-consistent shapes: 4 mini-batches of 128 frames,
    # input_dim=429 (39 MFCC x 11-frame context), H=256 (module default), 41 phonemes.
    NB, B = 4, 128
    INPUT_DIM, HIDDEN_DIM, OUTPUT_DIM = 429, 256, 41
    IN_PAD = _round_up(INPUT_DIM, 128)   # 512
    OUT_PAD = 128                        # lane-padded head width

    key = jax.random.PRNGKey(0)
    kx, kp = jax.random.split(key)
    # Producer emits bf16 activations (halves the kernel's dominant input DMA).
    x = jax.random.normal(kx, (NB, B, INPUT_DIM), jnp.float32).astype(jnp.bfloat16)
    params, ref_biases = init_params(
        kp, INPUT_DIM, HIDDEN_DIM, OUTPUT_DIM, in_pad=IN_PAD, out_pad=OUT_PAD)

    fwd = jax.jit(classifier_forward)
    logits_padded = fwd(x, params)
    jax.block_until_ready(logits_padded)
    assert logits_padded.shape == (NB, B, OUT_PAD), logits_padded.shape

    # Padded logit lanes are consumed masked downstream; slice only at the
    # host boundary for the correctness check.
    logits = logits_padded[..., :OUTPUT_DIM]
    ref = jnp.stack([reference_forward_one(x[i], params, ref_biases)
                     for i in range(NB)])[..., :OUTPUT_DIM]

    max_err = float(jnp.max(jnp.abs(logits - ref)))
    assert jnp.allclose(logits, ref, atol=2e-2, rtol=2e-2), max_err

    print("KERNEL_OK")
</pallas_src>

<mosaic_0001>
module attributes {stable_mosaic.version = 11 : i64} {
  func.func @classifier_kernel(%arg0: i32, %arg1: memref<1x128x429xbf16, #tpu.memory_space<vmem>>, %arg2: memref<8x256xf32, #tpu.memory_space<vmem>>, %arg3: memref<512x256xbf16, #tpu.memory_space<vmem>>, %arg4: memref<256x256xbf16, #tpu.memory_space<vmem>>, %arg5: memref<256x128xbf16, #tpu.memory_space<vmem>>, %arg6: memref<1x128x128xf32, #tpu.memory_space<vmem>>, %arg7: memref<128x512xbf16, #tpu.memory_space<vmem>>) attributes {dimension_semantics = [#tpu.dimension_semantics<parallel>], iteration_bounds = array<i64: 4>, scalar_prefetch = 0 : i64, scratch_operands = 1 : i64, tpu.core_type = #tpu.core_type<tc>, window_params = [{transform_indices = @transform_0, window_bounds = array<i64: 1, 128, 429>}, {pipeline_mode = #tpu.pipeline_mode<synchronous>, transform_indices = @transform_1, window_bounds = array<i64: 8, 256>}, {pipeline_mode = #tpu.pipeline_mode<synchronous>, transform_indices = @transform_2, window_bounds = array<i64: 512, 256>}, {pipeline_mode = #tpu.pipeline_mode<synchronous>, transform_indices = @transform_3, window_bounds = array<i64: 256, 256>}, {pipeline_mode = #tpu.pipeline_mode<synchronous>, transform_indices = @transform_4, window_bounds = array<i64: 256, 128>}, {transform_indices = @transform_5, window_bounds = array<i64: 1, 128, 128>}]} {
    %cst = arith.constant 0.000000e+00 : bf16
    %0 = vector.broadcast %cst : bf16 to vector<128x512xbf16>
    %c0 = arith.constant 0 : index
    %c0_0 = arith.constant 0 : index
    %1 = vector.load %arg7[%c0, %c0_0] : memref<128x512xbf16, #tpu.memory_space<vmem>>, vector<128x512xbf16>
    tpu.vector_store %arg7[%c0, %c0_0], %0 {strides = array<i32>} : memref<128x512xbf16, #tpu.memory_space<vmem>>, vector<128x512xbf16>,
    %c0_1 = arith.constant 0 : index
    %c0_2 = arith.constant 0 : index
    %c0_3 = arith.constant 0 : index
    %2 = vector.load %arg1[%c0_1, %c0_2, %c0_3] : memref<1x128x429xbf16, #tpu.memory_space<vmem>>, vector<1x128x429xbf16>
    %3 = vector.shape_cast %2 : vector<1x128x429xbf16> to vector<128x429xbf16>
    %c0_4 = arith.constant 0 : index
    %c0_5 = arith.constant 0 : index
    %4 = vector.load %arg7[%c0_4, %c0_5] : memref<128x512xbf16, #tpu.memory_space<vmem>>, vector<128x429xbf16>
    tpu.vector_store %arg7[%c0_4, %c0_5], %3 {strides = array<i32>} : memref<128x512xbf16, #tpu.memory_space<vmem>>, vector<128x429xbf16>,
    %c0_6 = arith.constant 0 : index
    %c0_7 = arith.constant 0 : index
    %5 = vector.load %arg2[%c0_6, %c0_7] : memref<8x256xf32, #tpu.memory_space<vmem>>, vector<1x256xf32>
    %c1 = arith.constant 1 : index
    %c0_8 = arith.constant 0 : index
    %6 = vector.load %arg2[%c1, %c0_8] : memref<8x256xf32, #tpu.memory_space<vmem>>, vector<1x256xf32>
    %c2 = arith.constant 2 : index
    %c0_9 = arith.constant 0 : index
    %7 = vector.load %arg2[%c2, %c0_9] : memref<8x256xf32, #tpu.memory_space<vmem>>, vector<1x256xf32>
    %c3 = arith.constant 3 : index
    %c0_10 = arith.constant 0 : index
    %8 = vector.load %arg2[%c3, %c0_10] : memref<8x256xf32, #tpu.memory_space<vmem>>, vector<1x256xf32>
    %c4 = arith.constant 4 : index
    %c0_11 = arith.constant 0 : index
    %9 = vector.load %arg2[%c4, %c0_11] : memref<8x256xf32, #tpu.memory_space<vmem>>, vector<1x128xf32>
    %c0_12 = arith.constant 0 : index
    %c0_13 = arith.constant 0 : index
    %10 = vector.load %arg7[%c0_12, %c0_13] : memref<128x512xbf16, #tpu.memory_space<vmem>>, vector<128x512xbf16>
    %c0_14 = arith.constant 0 : index
    %c0_15 = arith.constant 0 : index
    %11 = vector.load %arg3[%c0_14, %c0_15] : memref<512x256xbf16, #tpu.memory_space<vmem>>, vector<512x256xbf16>
    %cst_16 = arith.constant dense<0.000000e+00> : vector<128x256xf32>
    %12 = tpu.matmul %10, %11, %cst_16 {dimension_numbers = #tpu.dot_dimension_numbers<[1], [0], [0], [1], [0, 0, 1, 1], [], []>} : vector<128x512xbf16>, vector<512x256xbf16>, vector<128x256xf32> -> vector<128x256xf32>
    %cst_17 = arith.constant 1.000000e+00 : f32
    %13 = vector.broadcast %cst_17 : f32 to vector<8x128xf32>
    %cst_18 = arith.constant dense<0.000000e+00> : vector<8x256xf32>
    %14 = tpu.matmul %13, %12, %cst_18 {dimension_numbers = #tpu.dot_dimension_numbers<[1], [0], [0], [1], [0, 0, 1, 1], [], []>} : vector<8x128xf32>, vector<128x256xf32>, vector<8x256xf32> -> vector<8x256xf32>
    %15 = vector.extract_strided_slice %14 {offsets = [0, 0], sizes = [1, 256], strides = [1, 1]} : vector<8x256xf32> to vector<1x256xf32>
    %cst_19 = arith.constant 7.812500e-03 : f32
    %16 = vector.broadcast %cst_19 : f32 to vector<1x256xf32>
    %17 = arith.mulf %15, %16 : vector<1x256xf32>
    %18 = vector.broadcast %17 : vector<1x256xf32> to vector<128x256xf32>
    %19 = arith.subf %12, %18 : vector<128x256xf32>
    %20 = arith.mulf %19, %19 : vector<128x256xf32>
    %cst_20 = arith.constant dense<0.000000e+00> : vector<8x256xf32>
    %21 = tpu.matmul %13, %20, %cst_20 {dimension_numbers = #tpu.dot_dimension_numbers<[1], [0], [0], [1], [0, 0, 1, 1], [], []>} : vector<8x128xf32>, vector<128x256xf32>, vector<8x256xf32> -> vector<8x256xf32>
    %22 = vector.extract_strided_slice %21 {offsets = [0, 0], sizes = [1, 256], strides = [1, 1]} : vector<8x256xf32> to vector<1x256xf32>
    %cst_21 = arith.constant 7.812500e-03 : f32
    %23 = vector.broadcast %cst_21 : f32 to vector<1x256xf32>
    %24 = arith.mulf %22, %23 : vector<1x256xf32>
    %cst_22 = arith.constant 9.99999974E-6 : f32
    %25 = vector.broadcast %cst_22 : f32 to vector<1x256xf32>
    %26 = arith.addf %24, %25 : vector<1x256xf32>
    %27 = math.rsqrt %26 : vector<1x256xf32>
    %28 = arith.mulf %5, %27 : vector<1x256xf32>
    %29 = vector.broadcast %28 : vector<1x256xf32> to vector<128x256xf32>
    %30 = arith.mulf %19, %29 : vector<128x256xf32>
    %31 = vector.broadcast %6 : vector<1x256xf32> to vector<128x256xf32>
    %32 = arith.addf %30, %31 : vector<128x256xf32>
    %cst_23 = arith.constant 0.000000e+00 : f32
    %33 = vector.broadcast %cst_23 : f32 to vector<128x256xf32>
    %34 = arith.maximumf %32, %33 : vector<128x256xf32>
    %35 = arith.truncf %34 : vector<128x256xf32> to vector<128x256xbf16>
    %c0_24 = arith.constant 0 : index
    %c0_25 = arith.constant 0 : index
    %36 = vector.load %arg4[%c0_24, %c0_25] : memref<256x256xbf16, #tpu.memory_space<vmem>>, vector<256x256xbf16>
    %cst_26 = arith.constant dense<0.000000e+00> : vector<128x256xf32>
    %37 = tpu.matmul %35, %36, %cst_26 {dimension_numbers = #tpu.dot_dimension_numbers<[1], [0], [0], [1], [0, 0, 1, 1], [], []>} : vector<128x256xbf16>, vector<256x256xbf16>, vector<128x256xf32> -> vector<128x256xf32>
    %cst_27 = arith.constant 1.000000e+00 : f32
    %38 = vector.broadcast %cst_27 : f32 to vector<8x128xf32>
    %cst_28 = arith.constant dense<0.000000e+00> : vector<8x256xf32>
    %39 = tpu.matmul %38, %37, %cst_28 {dimension_numbers = #tpu.dot_dimension_numbers<[1], [0], [0], [1], [0, 0, 1, 1], [], []>} : vector<8x128xf32>, vector<128x256xf32>, vector<8x256xf32> -> vector<8x256xf32>
    %40 = vector.extract_strided_slice %39 {offsets = [0, 0], sizes = [1, 256], strides = [1, 1]} : vector<8x256xf32> to vector<1x256xf32>
    %cst_29 = arith.constant 7.812500e-03 : f32
    %41 = vector.broadcast %cst_29 : f32 to vector<1x256xf32>
    %42 = arith.mulf %40, %41 : vector<1x256xf32>
    %43 = vector.broadcast %42 : vector<1x256xf32> to vector<128x256xf32>
    %44 = arith.subf %37, %43 : vector<128x256xf32>
    %45 = arith.mulf %44, %44 : vector<128x256xf32>
    %cst_30 = arith.constant dense<0.000000e+00> : vector<8x256xf32>
    %46 = tpu.matmul %38, %45, %cst_30 {dimension_numbers = #tpu.dot_dimension_numbers<[1], [0], [0], [1], [0, 0, 1, 1], [], []>} : vector<8x128xf32>, vector<128x256xf32>, vector<8x256xf32> -> vector<8x256xf32>
    %47 = vector.extract_strided_slice %46 {offsets = [0, 0], sizes = [1, 256], strides = [1, 1]} : vector<8x256xf32> to vector<1x256xf32>
    %cst_31 = arith.constant 7.812500e-03 : f32
    %48 = vector.broadcast %cst_31 : f32 to vector<1x256xf32>
    %49 = arith.mulf %47, %48 : vector<1x256xf32>
    %cst_32 = arith.constant 9.99999974E-6 : f32
    %50 = vector.broadcast %cst_32 : f32 to vector<1x256xf32>
    %51 = arith.addf %49, %50 : vector<1x256xf32>
    %52 = math.rsqrt %51 : vector<1x256xf32>
    %53 = arith.mulf %7, %52 : vector<1x256xf32>
    %54 = vector.broadcast %53 : vector<1x256xf32> to vector<128x256xf32>
    %55 = arith.mulf %44, %54 : vector<128x256xf32>
    %56 = vector.broadcast %8 : vector<1x256xf32> to vector<128x256xf32>
    %57 = arith.addf %55, %56 : vector<128x256xf32>
    %cst_33 = arith.constant 0.000000e+00 : f32
    %58 = vector.broadcast %cst_33 : f32 to vector<128x256xf32>
    %59 = arith.maximumf %57, %58 : vector<128x256xf32>
    %60 = arith.truncf %59 : vector<128x256xf32> to vector<128x256xbf16>
    %c0_34 = arith.constant 0 : index
    %c0_35 = arith.constant 0 : index
    %61 = vector.load %arg5[%c0_34, %c0_35] : memref<256x128xbf16, #tpu.memory_space<vmem>>, vector<256x128xbf16>
    %cst_36 = arith.constant dense<0.000000e+00> : vector<128x128xf32>
    %62 = tpu.matmul %60, %61, %cst_36 {dimension_numbers = #tpu.dot_dimension_numbers<[1], [0], [0], [1], [0, 0, 1, 1], [], []>} : vector<128x256xbf16>, vector<256x128xbf16>, vector<128x128xf32> -> vector<128x128xf32>
    %63 = vector.broadcast %9 : vector<1x128xf32> to vector<128x128xf32>
    %64 = arith.addf %62, %63 : vector<128x128xf32>
    %c0_37 = arith.constant 0 : index
    %c0_38 = arith.constant 0 : index
    %c0_39 = arith.constant 0 : index
    %65 = vector.load %arg6[%c0_37, %c0_38, %c0_39] : memref<1x128x128xf32, #tpu.memory_space<vmem>>, vector<1x128x128xf32>
    %66 = vector.shape_cast %65 : vector<1x128x128xf32> to vector<128x128xf32>
    %67 = vector.shape_cast %64 : vector<128x128xf32> to vector<1x128x128xf32>
    tpu.vector_store %arg6[%c0_37, %c0_38, %c0_39], %67 {strides = array<i32>} : memref<1x128x128xf32, #tpu.memory_space<vmem>>, vector<1x128x128xf32>,
    return
  }
  func.func @transform_0(%arg0: i32) -> (i32, i32, i32) {
    %c0_i32 = arith.constant 0 : i32
    %c0_i32_0 = arith.constant 0 : i32
    %c0_i32_1 = arith.constant 0 : i32
    return %arg0, %c0_i32, %c0_i32_0 : i32, i32, i32
  }
  func.func @transform_1(%arg0: i32) -> (i32, i32) {
    %c0_i32 = arith.constant 0 : i32
    %c0_i32_0 = arith.constant 0 : i32
    %c0_i32_1 = arith.constant 0 : i32
    return %c0_i32, %c0_i32_0 : i32, i32
  }
  func.func @transform_2(%arg0: i32) -> (i32, i32) {
    %c0_i32 = arith.constant 0 : i32
    %c0_i32_0 = arith.constant 0 : i32
    %c0_i32_1 = arith.constant 0 : i32
    return %c0_i32, %c0_i32_0 : i32, i32
  }
  func.func @transform_3(%arg0: i32) -> (i32, i32) {
    %c0_i32 = arith.constant 0 : i32
    %c0_i32_0 = arith.constant 0 : i32
    %c0_i32_1 = arith.constant 0 : i32
    return %c0_i32, %c0_i32_0 : i32, i32
  }
  func.func @transform_4(%arg0: i32) -> (i32, i32) {
    %c0_i32 = arith.constant 0 : i32
    %c0_i32_0 = arith.constant 0 : i32
    %c0_i32_1 = arith.constant 0 : i32
    return %c0_i32, %c0_i32_0 : i32, i32
  }
  func.func @transform_5(%arg0: i32) -> (i32, i32, i32) {
    %c0_i32 = arith.constant 0 : i32
    %c0_i32_0 = arith.constant 0 : i32
    %c0_i32_1 = arith.constant 0 : i32
    return %arg0, %c0_i32, %c0_i32_0 : i32, i32, i32
  }
}

</mosaic_0001>

<bundles_post_ra>
// kernel: classifier_forward.1
= control target key start
LH: loop header
LB: loop body
LE: loop exit
PB: predicated region body
PF: predicated region fallthrough
CT: control target
= control target key end

     0   :  { %10 = vsyncpa [#allocation4], 0  ;;  %s4534_s0 = inlined_call_operand.vmem [shape: bf16[4,128,429], index: 0, kind: input, shape index: {}]   ;;  %s4535_s1 = inlined_call_operand.vmem [shape: f32[8,256], index: 1, kind: input, shape index: {}]   ;;  %s4536_s2 = inlined_call_operand.vmem [shape: bf16[512,256], index: 2, kind: input, shape index: {}]   ;;  %s4537_s3 = inlined_call_operand.vmem [shape: bf16[256,256], index: 3, kind: input, shape index: {}]   ;;  %s4538_s4 = inlined_call_operand.vmem [shape: bf16[256,128], index: 4, kind: input, shape index: {}]   ;;  %s4539_s5 = inlined_call_operand.hbm [shape: f32[4,128,128], index: 5, kind: output, shape index: {}]  }
   0x1   :  { %12 = vsyncpa [#allocation4 + $0x1], 0  ;;  %s3075_s18 = smov 0   ;;  %s3077_s19 = smov 0  }
   0x2   :  { %s3079_s20 = smov 0   ;;  %s3081_s21 = smov 0  }
   0x3 LB: > { %s3096_s22 = sadd.s32 4294967295, %s3036_s21   ;;  %s2505_s23 = sadd.s32 4294967294, %s3036_s21   ;;  %s3036_s21 = sphi %s3081_s21, %s4547_s21   ;;  %s3032_s20 = sphi %s3079_s20, %s4546_s20   ;;  %s3028_s19 = sphi %s3077_s19, %s4545_s19   ;;  %s3024_s18 = sphi %s3075_s18, %s4544_s18  }
   0x4   : > { %s3100_s24 = sadd.s32 1, %s3036_s21   ;;  %s135_s25 = sadd.s32 1, %s3032_s20 }
   0x5   : > { %s132_s26 = ssub.s32 %s3036_s21, %s3100_s24  ;;  %p145_p0 = scmp.ne.s32.totalorder %s3032_s20, %s3028_s19 }
   0x6   : > { %p133_p1 = scmp.eq.s32.totalorder %s132_s26, 0  ;;  %p146_p2 = scmp.eq.s32.totalorder %s3096_s22, 3 }
   0x7   : > { %p151_p3 = scmp.ne.s32.totalorder %s3028_s19, %s3024_s18  ;;  %p152_p4 = scmp.eq.s32.totalorder %s2505_s23, 3 }
   0x8   : > { %s3111_s27 = scalar_select %p133_p1, %s3032_s20, %s135_s25  }
   0x9   : > { %p3113_p5 = por %p146_p2, %p145_p0  ;;  %p3117_p6 = por %p152_p4, %p151_p3 }
   0xa   : > { %p2508_p7 = scmp.ge.s32.totalorder %s3036_s21, 1  ;;  %p190_p8 = scmp.lt.s32.totalorder %s3036_s21, 5 }
   0xc   : > { %p191_p9 = pnand %p2508_p7, %p190_p8 }
   0xd   : > { %p218_p10 = scmp.lt.s32.totalorder (!%p191_p9), %s3096_s22, 3  ;;  %s2665_s9 = sshll.u32 (!%p191_p9), %s3096_s22, 11 }
   0xe   : > { %194 = sbr.rel (%p191_p9) target bundleno = 1868 (0x74c), region = 40  ;;  %s4486_s12 = scalar_lea.hbm (!%p191_p9), %s4539_s5, %s2665_s9 }
   0xf   : > { %s3042_s14 = smov (!%p191_p9), [#allocation3]  }
  0x10   : > { %s2980_s15 = sshll.u32 (!%p191_p9), %s3042_s14, 4  ;;  %s2981_s15 = int_to_ptr.vmem [resolvable:$false] %s2980_s15 }
  0x11   : > { %s2982_s16 = scalar_lea.vmem (!%p191_p9), %s2981_s15, 4096 }
  0x13   : > { %v2775_v0 = vld [vmem:[%s4536_s2 + $0x74] ss:$8 sps:$4 sm:$0xff]   ;;  %v3038_v2 = vmov 0   ;;  %v2779_v3 = vld [vmem:[%s4536_s2 + $0x70] ss:$8 sps:$4 sm:$0xff]   ;;  %s219_s17 = scalar_select %p218_p10, %s3096_s22, 3 }
  0x14   : > { %v2777_v1 = vld [vmem:[%s4536_s2 + $0x174] ss:$8 sps:$4 sm:$0xff]   ;;  %225 = vst [vmem:[#allocation2 + $0x8] sm:$0xff] %v3038_v2  ;;  %227 = vst [vmem:[#allocation2 + $0x18] sm:$0xff] %v3038_v2  ;;  %907 = vmatprep.subr.bf16.mxu0 %v2775_v0  ;;  %v2780_v4 = vld [vmem:[%s4536_s2 + $0x170] ss:$8 sps:$4 sm:$0xff]  }
  0x15   : > { %229 = vst [vmem:[#allocation2 + $0x28] sm:$0xff] %v3038_v2  ;;  %231 = vst [vmem:[#allocation2 + $0x38] sm:$0xff] %v3038_v2  ;;  %1020 = vmatprep.subr.bf16.mxu1 %v2777_v1  ;;  %v2781_v5 = vld [vmem:[%s4536_s2 + $0x64] ss:$8 sps:$4 sm:$0xff]   ;;  %908 = vmatpush1.bf16.msra.mxu0 %v2779_v3  ;;  %v2785_v7 = vld [vmem:[%s4536_s2 + $0x60] ss:$8 sps:$4 sm:$0xff]  }
  0x16   : > { %233 = vst [vmem:[#allocation2 + $0x48] sm:$0xff] %v3038_v2  ;;  %235 = vst [vmem:[#allocation2 + $0x58] sm:$0xff] %v3038_v2  ;;  %1021 = vmatpush1.bf16.msra.mxu1 %v2780_v4  ;;  %v2783_v6 = vld [vmem:[%s4536_s2 + $0x164] ss:$8 sps:$4 sm:$0xff]   ;;  %909 = vmatprep.subr.bf16.mxu0 %v2781_v5  ;;  %v2786_v8 = vld [vmem:[%s4536_s2 + $0x160] ss:$8 sps:$4 sm:$0xff]  }
  0x17   : > { %237 = vst [vmem:[#allocation2 + $0x68] sm:$0xff] %v3038_v2  ;;  %239 = vst [vmem:[#allocation2 + $0x78] sm:$0xff] %v3038_v2  ;;  %1022 = vmatprep.subr.bf16.mxu1 %v2783_v6  ;;  %v2787_v9 = vld [vmem:[%s4536_s2 + $0x54] ss:$8 sps:$4 sm:$0xff]   ;;  %v2791_v11 = vld [vmem:[%s4536_s2 + $0x50] ss:$8 sps:$4 sm:$0xff]  }
  0x18   : > { %241 = vst [vmem:[#allocation2 + $0x88] sm:$0xff] %v3038_v2  ;;  %243 = vst [vmem:[#allocation2 + $0x98] sm:$0xff] %v3038_v2  ;;  %v2789_v10 = vld [vmem:[%s4536_s2 + $0x154] ss:$8 sps:$4 sm:$0xff]   ;;  %v2792_v12 = vld [vmem:[%s4536_s2 + $0x150] ss:$8 sps:$4 sm:$0xff]  }
  0x19   : > { %245 = vst [vmem:[#allocation2 + $0xa8] sm:$0xff] %v3038_v2  ;;  %247 = vst [vmem:[#allocation2 + $0xb8] sm:$0xff] %v3038_v2  ;;  %910 = vmatpush1.bf16.msra.mxu0 %v2785_v7  ;;  %v2793_v13 = vld [vmem:[%s4536_s2 + $0x44] ss:$8 sps:$4 sm:$0xff]   ;;  %v2797_v15 = vld [vmem:[%s4536_s2 + $0x40] ss:$8 sps:$4 sm:$0xff]  }
  0x1a   : > { %249 = vst [vmem:[#allocation2 + $0xc8] sm:$0xff] %v3038_v2  ;;  %251 = vst [vmem:[#allocation2 + $0xd8] sm:$0xff] %v3038_v2  ;;  %1023 = vmatpush1.bf16.msra.mxu1 %v2786_v8  ;;  %911 = vmatprep.subr.bf16.mxu0 %v2787_v9  ;;  %v2795_v14 = vld [vmem:[%s4536_s2 + $0x144] ss:$8 sps:$4 sm:$0xff]   ;;  %v2798_v16 = vld [vmem:[%s4536_s2 + $0x140] ss:$8 sps:$4 sm:$0xff]  }
  0x1b   : > { %253 = vst [vmem:[#allocation2 + $0xe8] sm:$0xff] %v3038_v2  ;;  %255 = vst [vmem:[#allocation2 + $0xf8] sm:$0xff] %v3038_v2  ;;  %1024 = vmatprep.subr.bf16.mxu1 %v2789_v10  ;;  %v2799_v17 = vld [vmem:[%s4536_s2 + $0x34] ss:$8 sps:$4 sm:$0xff]   ;;  %v2803_v19 = vld [vmem:[%s4536_s2 + $0x30] ss:$8 sps:$4 sm:$0xff]  }
  0x1c   : > { %v2801_v18 = vld [vmem:[%s4536_s2 + $0x134] ss:$8 sps:$4 sm:$0xff]   ;;  %v2804_v20 = vld [vmem:[%s4536_s2 + $0x130] ss:$8 sps:$4 sm:$0xff]   ;;  %v2805_v21 = vld [vmem:[%s4536_s2 + $0x24] ss:$8 sps:$4 sm:$0xff]  }
  0x1d   : > { %912 = vmatpush1.bf16.msra.mxu0 %v2791_v11  ;;  %v2807_v22 = vld [vmem:[%s4536_s2 + $0x124] ss:$8 sps:$4 sm:$0xff]   ;;  %v2809_v23 = vld [vmem:[%s4536_s2 + $0x20] ss:$8 sps:$4 sm:$0xff]   ;;  %v2811_v25 = vld [vmem:[%s4536_s2 + $0x14] ss:$8 sps:$4 sm:$0xff]  }
  0x1e   : > { %1025 = vmatpush1.bf16.msra.mxu1 %v2792_v12  ;;  %913 = vmatprep.subr.bf16.mxu0 %v2793_v13  ;;  %v2810_v24 = vld [vmem:[%s4536_s2 + $0x120] ss:$8 sps:$4 sm:$0xff]   ;;  %v2813_v26 = vld [vmem:[%s4536_s2 + $0x114] ss:$8 sps:$4 sm:$0xff]   ;;  %v2815_v27 = vld [vmem:[%s4536_s2 + $0x10] ss:$8 sps:$4 sm:$0xff]  }
  0x1f   : > { %1026 = vmatprep.subr.bf16.mxu1 %v2795_v14  ;;  %v2816_v28 = vld [vmem:[%s4536_s2 + $0x110] ss:$8 sps:$4 sm:$0xff]   ;;  %v2817_v29 = vld [vmem:[%s4536_s2 + $0x4] ss:$8 sps:$4 sm:$0xff]   ;;  %v2821_v31 = vld [vmem:[%s4536_s2] ss:$8 sps:$4 sm:$0xff]  }
  0x20   : > { %v2819_v30 = vld [vmem:[%s4536_s2 + $0x104] ss:$8 sps:$4 sm:$0xff]   ;;  %v2822_v32 = vld [vmem:[%s4536_s2 + $0x100] ss:$8 sps:$4 sm:$0xff]   ;;  %v2823_v33 = vld [vmem:[%s4536_s2 + $0xf4] ss:$8 sps:$4 sm:$0xff]  }
  0x21   : > { %914 = vmatpush1.bf16.msra.mxu0 %v2797_v15  ;;  %v2825_v34 = vld [vmem:[%s4536_s2 + $0x1f4] ss:$8 sps:$4 sm:$0xff]   ;;  %v2827_v35 = vld [vmem:[%s4536_s2 + $0xf0] ss:$8 sps:$4 sm:$0xff]   ;;  %v2829_v37 = vld [vmem:[%s4536_s2 + $0xe4] ss:$8 sps:$4 sm:$0xff]  }
  0x22   : > { %1027 = vmatpush1.bf16.msra.mxu1 %v2798_v16  ;;  %915 = vmatprep.subr.bf16.mxu0 %v2799_v17  ;;  %v2828_v36 = vld [vmem:[%s4536_s2 + $0x1f0] ss:$8 sps:$4 sm:$0xff]   ;;  %v2831_v38 = vld [vmem:[%s4536_s2 + $0x1e4] ss:$8 sps:$4 sm:$0xff]   ;;  %v2833_v39 = vld [vmem:[%s4536_s2 + $0xe0] ss:$8 sps:$4 sm:$0xff]  }
  0x23   : > { %1028 = vmatprep.subr.bf16.mxu1 %v2801_v18  ;;  %v2834_v40 = vld [vmem:[%s4536_s2 + $0x1e0] ss:$8 sps:$4 sm:$0xff]   ;;  %v2835_v41 = vld [vmem:[%s4536_s2 + $0xd4] ss:$8 sps:$4 sm:$0xff]   ;;  %s2664_s10 = sshll.u32 %s219_s17, 8  ;;  %vm289_vm0 = vcmask 1043456  }
  0x24   : > { %v2837_v42 = vld [vmem:[%s4536_s2 + $0x1d4] ss:$8 sps:$4 sm:$0xff]   ;;  %v2839_v43 = vld [vmem:[%s4536_s2 + $0xd0] ss:$8 sps:$4 sm:$0xff]   ;;  %v2841_v45 = vld [vmem:[%s4536_s2 + $0xc4] ss:$8 sps:$4 sm:$0xff]   ;;  %s3263_s26 = scalar_lea.vmem %s4534_s0, %s2664_s10 }
  0x25   : > { %916 = vmatpush1.bf16.msra.mxu0 %v2803_v19  ;;  %v2840_v44 = vld [vmem:[%s4536_s2 + $0x1d0] ss:$8 sps:$4 sm:$0xff]   ;;  %v2843_v46 = vld [vmem:[%s4536_s2 + $0x1c4] ss:$8 sps:$4 sm:$0xff]   ;;  %vm290_vm1 = vcmask 367620   ;;  %s215_s17 = sand.u32 1, %s3028_s19  }
  0x26   : > { %1029 = vmatpush1.bf16.msra.mxu1 %v2804_v20  ;;  %917 = vmatprep.subr.bf16.mxu0 %v2805_v21  ;;  %v2845_v47 = vld [vmem:[%s4536_s2 + $0xc0] ss:$8 sps:$4 sm:$0xff]   ;;  %v2847_v50 = vld [vmem:[%s4536_s2 + $0xb4] ss:$8 sps:$4 sm:$0xff]   ;;  %vm3290_vm2 = vmor %vm290_vm1, %vm289_vm0  ;;  %s2509_s30 = sshll.u32 %s215_s17, 7  ;;  %s4494_s13 = scalar_lea.sflag [#allocation4], %s215_s17 }
  0x27   : > { %1030 = vmatprep.subr.bf16.mxu1 %v2807_v22  ;;  %v2846_v48 = vld [vmem:[%s4536_s2 + $0x1c0] ss:$8 sps:$4 sm:$0xff]   ;;  %v2849_v51 = vld [vmem:[%s4536_s2 + $0x1b4] ss:$8 sps:$4 sm:$0xff]   ;;  %v2851_v62 = vld [vmem:[%s4536_s2 + $0xb0] ss:$8 sps:$4 sm:$0xff]  }
  0x28   : > { %v3275_v49 = vld [vmem:[%s3263_s26] sm:$0xff]  ;;  %v3284_v52 = vld [vmem:[%s3263_s26 + $0x10] sm:$0xff]  ;;  %v257_v53 = vld [vmem:[%s3263_s26 + $0x8] sm:$0xff]  ;;  %s4450_s8 = scalar_lea.vmem [#allocation3], %s2509_s30 }
  0x29   : > { %918 = vmatpush1.bf16.msra.mxu0 %v2809_v23  ;;  %v259_v54 = vld [vmem:[%s3263_s26 + $0x18] sm:$0xff]  ;;  %v2516_v55 = vcombine.high %v3275_v49, %v3284_v52  ;;  %v3295_v57 = vld [vmem:[%s3263_s26 + $0x20] sm:$0xff]  ;;  %v3298_v58 = vld [vmem:[%s3263_s26 + $0x30] sm:$0xff]  ;;  %292 = vst.msk [vmem:[#allocation2 + $0x8] sm:$0xff] %vm3290_vm2, %v257_v53  ;;  %s2443_s10 = sshll.u32 %s4450_s8, 4  ;;  %s4488_s10 = int_to_ptr.vmem [resolvable:$true] %s2443_s10 }
  0x2a   : > { %1031 = vmatpush1.bf16.msra.mxu1 %v2810_v24  ;;  %919 = vmatprep.subr.bf16.mxu0 %v2811_v25  ;;  %294 = vst.msk [vmem:[#allocation2 + $0x18] sm:$0xff] %vm3290_vm2, %v259_v54  ;;  %v261_v59 = vld [vmem:[%s3263_s26 + $0x28] sm:$0xff]  ;;  %v263_v60 = vld [vmem:[%s3263_s26 + $0x38] sm:$0xff]  ;;  %v3307_v61 = vld [vmem:[%s3263_s26 + $0x40] sm:$0xff]  ;;  %s2976_s22 = scalar_lea.vmem %s4488_s10, 2048  ;;  %p2983_p0 = scmp.lt.s32.totalorder %s4488_s10, %s2981_s15 }
  0x2b   : > { %1032 = vmatprep.subr.bf16.mxu1 %v2813_v26  ;;  %v2852_v63 = vld [vmem:[%s4536_s2 + $0x1b0] ss:$8 sps:$4 sm:$0xff]   ;;  %939 = vmatprep.mubr.bf16.mxu0 %v2516_v55  ;;  %296 = vst.msk [vmem:[#allocation2 + $0x28] sm:$0xff] %vm3290_vm2, %v261_v59  ;;  %298 = vst.msk [vmem:[#allocation2 + $0x38] sm:$0xff] %vm3290_vm2, %v263_v60  ;;  %v265_v1 = vld [vmem:[%s3263_s26 + $0x48] sm:$0xff]  ;;  %p2977_p11 = scmp.ne.s32.totalorder %s4488_s10, %s2976_s22  ;;  %p2984_p1 = scmp.lt.s32.totalorder %s2982_s16, %s2976_s22 }
  0x2c   : > { %v3320_v0 = vld [vmem:[%s3263_s26 + $0x50] sm:$0xff]  ;;  %v267_v2 = vld [vmem:[%s3263_s26 + $0x58] sm:$0xff]  ;;  %v2853_v3 = vld [vmem:[%s4536_s2 + $0xa4] ss:$8 sps:$4 sm:$0xff]   ;;  %300 = vst.msk [vmem:[#allocation2 + $0x48] sm:$0xff] %vm3290_vm2, %v265_v1 }
  0x2d   : > { %920 = vmatpush1.bf16.msra.mxu0 %v2815_v27  ;;  %v2855_v4 = vld [vmem:[%s4536_s2 + $0x1a4] ss:$8 sps:$4 sm:$0xff]   ;;  %302 = vst.msk [vmem:[#allocation2 + $0x58] sm:$0xff] %vm3290_vm2, %v267_v2  ;;  %v3338_v6 = vld [vmem:[%s3263_s26 + $0x70] sm:$0xff]  ;;  %v271_v8 = vld [vmem:[%s3263_s26 + $0x78] sm:$0xff]  ;;  %v3039_v2 = vmov 0.0   ;;  %p2978_p12 = pnand %p2977_p11, %p3113_p5  ;;  %p2985_p2 = por %p2984_p1, %p2983_p0 }
  0x2e   : > { %1033 = vmatpush1.bf16.msra.mxu1 %v2816_v28  ;;  %921 = vmatprep.subr.bf16.mxu0 %v2817_v29  ;;  %v3335_v5 = vld [vmem:[%s3263_s26 + $0x60] sm:$0xff]  ;;  %v269_v7 = vld [vmem:[%s3263_s26 + $0x68] sm:$0xff]  ;;  %v3348_v10 = vld [vmem:[%s3263_s26 + $0x90] sm:$0xff]  ;;  %306 = vst.msk [vmem:[#allocation2 + $0x78] sm:$0xff] %vm3290_vm2, %v271_v8 }
  0x2f   : > { %1034 = vmatprep.subr.bf16.mxu1 %v2819_v30  ;;  %304 = vst.msk [vmem:[#allocation2 + $0x68] sm:$0xff] %vm3290_vm2, %v269_v7  ;;  %v3345_v9 = vld [vmem:[%s3263_s26 + $0x80] sm:$0xff]  ;;  %v273_v11 = vld [vmem:[%s3263_s26 + $0x88] sm:$0xff]  ;;  %v275_v12 = vld [vmem:[%s3263_s26 + $0x98] sm:$0xff]  ;;  %p2979_p13 = pneg %p2978_p12 }
  0x30   : > { %v3355_v13 = vld [vmem:[%s3263_s26 + $0xa0] sm:$0xff]  ;;  %308 = vst.msk [vmem:[#allocation2 + $0x88] sm:$0xff] %vm3290_vm2, %v273_v11  ;;  %310 = vst.msk [vmem:[#allocation2 + $0x98] sm:$0xff] %vm3290_vm2, %v275_v12  ;;  %v3368_v16 = vld [vmem:[%s3263_s26 + $0xb0] sm:$0xff] }
  0x31   : > { %922 = vmatpush1.bf16.msra.mxu0 %v2821_v31  ;;  %v2857_v14 = vld [vmem:[%s4536_s2 + $0xa0] ss:$8 sps:$4 sm:$0xff]   ;;  %v279_v18 = vld [vmem:[%s3263_s26 + $0xb8] sm:$0xff]  ;;  %v3383_v21 = vld [vmem:[%s3263_s26 + $0xd0] sm:$0xff]  ;;  %v2536_v54 = vcombine.high %v3355_v13, %v3368_v16  ;;  %v2535_v56 = vcombine.low %v3355_v13, %v3368_v16  ;;  %p2986_p3 = pnand %p2985_p2, %p2979_p13 }
  0x32   : > { %1035 = vmatpush1.bf16.msra.mxu1 %v2822_v32  ;;  %923 = vmatprep.subr.bf16.mxu0 %v2823_v33  ;;  %v2858_v15 = vld [vmem:[%s4536_s2 + $0x1a0] ss:$8 sps:$4 sm:$0xff]   ;;  %v2859_v19 = vld [vmem:[%s4536_s2 + $0x94] ss:$8 sps:$4 sm:$0xff]   ;;  %314 = vst.msk [vmem:[#allocation2 + $0xb8] sm:$0xff] %vm3290_vm2, %v279_v18 }
  0x33   : > { %1036 = vmatprep.subr.bf16.mxu1 %v2825_v34  ;;  %v277_v17 = vld [vmem:[%s3263_s26 + $0xa8] sm:$0xff]  ;;  %v3380_v20 = vld [vmem:[%s3263_s26 + $0xc0] sm:$0xff]  ;;  %v2861_v23 = vld [vmem:[%s4536_s2 + $0x194] ss:$8 sps:$4 sm:$0xff]  }
  0x34   : > { %312 = vst.msk [vmem:[#allocation2 + $0xa8] sm:$0xff] %vm3290_vm2, %v277_v17  ;;  %v281_v22 = vld [vmem:[%s3263_s26 + $0xc8] sm:$0xff]  ;;  %v2863_v25 = vld [vmem:[%s4536_s2 + $0x90] ss:$8 sps:$4 sm:$0xff]   ;;  %v3411_v32 = vld [vmem:[%s3263_s26 + $0xe0] sm:$0xff]  ;;  %v2539_v60 = vcombine.low %v3380_v20, %v3383_v21 }
  0x35   : > { %924 = vmatpush2.bf16.msra.mxu0 %v2827_v35  ;;  %316 = vst.msk [vmem:[#allocation2 + $0xc8] sm:$0xff] %vm3290_vm2, %v281_v22  ;;  %v2875_v24 = vld [vmem:[#allocation2 + $0xc] ss:$16 sps:$4 sm:$0xff]   ;;  %v2864_v26 = vld [vmem:[%s4536_s2 + $0x190] ss:$8 sps:$4 sm:$0xff]  }
  0x36   : > { %1037 = vmatpush2.bf16.msra.mxu1 %v2828_v36  ;;  %925 = vmatprep.subr.bf16.mxu0 %v2829_v37  ;;  %v2865_v27 = vld [vmem:[%s4536_s2 + $0x84] ss:$8 sps:$4 sm:$0xff]   ;;  %v2869_v29 = vld [vmem:[%s4536_s2 + $0x80] ss:$8 sps:$4 sm:$0xff]   ;;  %v283_v31 = vld [vmem:[%s3263_s26 + $0xd8] sm:$0xff] }
  0x37   : > { %1038 = vmatprep.subr.bf16.mxu1 %v2831_v38  ;;  %1052 = vmatprep.mubr.bf16.mxu1 %v2875_v24  ;;  %v2867_v28 = vld [vmem:[%s4536_s2 + $0x184] ss:$8 sps:$4 sm:$0xff]   ;;  %v2870_v30 = vld [vmem:[%s4536_s2 + $0x180] ss:$8 sps:$4 sm:$0xff]   ;;  %318 = vst.msk [vmem:[#allocation2 + $0xd8] sm:$0xff] %vm3290_vm2, %v283_v31  ;;  %v3416_v34 = vld [vmem:[%s3263_s26 + $0xf0] sm:$0xff]  ;;  %v2515_v38 = vcombine.low %v3275_v49, %v3284_v52  ;;  %v2531_v52 = vcombine.low %v3345_v9, %v3348_v10 }
  0x38   : > { %v2873_v33 = vld [vmem:[#allocation2 + $0x8] ss:$16 sps:$4 sm:$0xff]   ;;  %v2877_v37 = vld [vmem:[#allocation2 + $0x2c] ss:$16 sps:$4 sm:$0xff]  }
  0x39   : > { %926 = vmatpush2.bf16.msra.mxu0 %v2833_v39  ;;  %v285_v35 = vld [vmem:[%s3263_s26 + $0xe8] sm:$0xff]  ;;  %v287_v36 = vld [vmem:[%s3263_s26 + $0xf8] sm:$0xff]  ;;  %v2520_v39 = vcombine.high %v3295_v57, %v3298_v58 }
  0x3a   : > { %1039 = vmatpush2.bf16.msra.mxu1 %v2834_v40  ;;  %927 = vmatprep.subr.bf16.mxu0 %v2835_v41  ;;  %320 = vst.msk [vmem:[#allocation2 + $0xe8] sm:$0xff] %vm3290_vm2, %v285_v35  ;;  %322 = vst.msk [vmem:[#allocation2 + $0xf8] sm:$0xff] %vm3290_vm2, %v287_v36  ;;  %v2879_v40 = vld [vmem:[#allocation2 + $0x28] ss:$16 sps:$4 sm:$0xff]   ;;  %v2881_v41 = vld [vmem:[#allocation2 + $0x4c] ss:$16 sps:$4 sm:$0xff]  }
  0x3b   : > { %1040 = vmatprep.subr.bf16.mxu1 %v2837_v42  ;;  %v2519_v42 = vcombine.low %v3295_v57, %v3298_v58  ;;  %v2887_v49 = vld [vmem:[#allocation2 + $0x68] ss:$16 sps:$4 sm:$0xff]   ;;  %v2893_v55 = vld [vmem:[#allocation2 + $0xac] ss:$16 sps:$4 sm:$0xff]   ;;  %v2540_v58 = vcombine.high %v3380_v20, %v3383_v21 }
  0x3c   : > { %v2891_v53 = vld [vmem:[#allocation2 + $0x88] ss:$16 sps:$4 sm:$0xff]  }
  0x3d   : > { %928 = vmatpush2.bf16.msra.mxu0 %v2839_v43  ;;  %v2524_v43 = vcombine.high %v3307_v61, %v3320_v0  ;;  %v2895_v57 = vld [vmem:[#allocation2 + $0xa8] ss:$16 sps:$4 sm:$0xff]  }
  0x3e   : > { %1041 = vmatpush2.bf16.msra.mxu1 %v2840_v44  ;;  %929 = vmatprep.subr.bf16.mxu0 %v2841_v45  ;;  %v2883_v44 = vld [vmem:[#allocation2 + $0x48] ss:$16 sps:$4 sm:$0xff]   ;;  %v2885_v45 = vld [vmem:[#allocation2 + $0x6c] ss:$16 sps:$4 sm:$0xff]  }
  0x3f   : > { %1042 = vmatprep.subr.bf16.mxu1 %v2843_v46  ;;  %v2523_v46 = vcombine.low %v3307_v61, %v3320_v0  ;;  %v2897_v59 = vld [vmem:[#allocation2 + $0xcc] ss:$16 sps:$4 sm:$0xff]   ;;  %v2899_v61 = vld [vmem:[#allocation2 + $0xc8] ss:$16 sps:$4 sm:$0xff]   ;;  %v2543_v0 = vcombine.low %v3411_v32, %v3416_v34 }
  0x41   : > { %930 = vmatpush2.bf16.msra.mxu0 %v2845_v47  ;;  %v2528_v47 = vcombine.high %v3335_v5, %v3338_v6  ;;  %v2903_v1 = vld [vmem:[#allocation2 + $0xe8] ss:$16 sps:$4 sm:$0xff]  }
  0x42   : > { %1043 = vmatpush2.bf16.msra.mxu1 %v2846_v48  ;;  %931 = vmatprep.subr.bf16.mxu0 %v2847_v50  ;;  %v2527_v48 = vcombine.low %v3335_v5, %v3338_v6  ;;  %v2532_v50 = vcombine.high %v3345_v9, %v3348_v10 }
  0x43   : > { %1044 = vmatprep.subr.bf16.mxu1 %v2849_v51  ;;  %v2889_v51 = vld [vmem:[#allocation2 + $0x8c] ss:$16 sps:$4 sm:$0xff]  }
  0x45   : > { %932 = vmatpush2.bf16.msra.mxu0 %v2851_v62  ;;  %v2544_v62 = vcombine.high %v3411_v32, %v3416_v34 }
  0x46   : > { %1045 = vmatpush2.bf16.msra.mxu1 %v2852_v63  ;;  %933 = vmatprep.subr.bf16.mxu0 %v2853_v3  ;;  %v2901_v63 = vld [vmem:[#allocation2 + $0xec] ss:$16 sps:$4 sm:$0xff]  }
  0x47   : > { %1046 = vmatprep.subr.bf16.mxu1 %v2855_v4 }
  0x49   : > { %934 = vmatpush2.bf16.msra.mxu0 %v2857_v14 }
  0x4a   : > { %1047 = vmatpush2.bf16.msra.mxu1 %v2858_v15  ;;  %935 = vmatprep.subr.bf16.mxu0 %v2859_v19 }
  0x4b   : > { %1048 = vmatprep.subr.bf16.mxu1 %v2861_v23 }
  0x4d   : > { %936 = vmatpush2.bf16.msra.mxu0 %v2863_v25 }
  0x4e   : > { %1049 = vmatpush2.bf16.msra.mxu1 %v2864_v26  ;;  %937 = vmatprep.subr.bf16.mxu0 %v2865_v27 }
  0x4f   : > { %1050 = vmatprep.subr.bf16.mxu1 %v2867_v28 }
  0x51   : > { %938 = vmatpush2.bf16.msra.mxu0 %v2869_v29 }
  0x52   : > { %1051 = vmatpush2.bf16.msra.mxu1 %v2870_v30 }
  0x54   : > { %940 = vmatmul.mubr.bf16.vlgmr.msra.gmra.mxu0 %v2515_v38 }
  0x55   : > { %1053 = vmatmul.mubr.bf16.vlgmr.msra.gmra.mxu1 %v2873_v33  ;;  %949 = vmatprep.mubr.bf16.mxu0 %v2520_v39 }
  0x56   : > { %1062 = vmatprep.mubr.bf16.mxu1 %v2877_v37 }
  0x5c   : > { %950 = vmatmul.mubr.bf16.gmra.mxu0 %v2519_v42 }
  0x5d   : > { %1063 = vmatmul.mubr.bf16.gmra.mxu1 %v2879_v40  ;;  %959 = vmatprep.mubr.bf16.mxu0 %v2524_v43 }
  0x5e   : > { %1072 = vmatprep.mubr.bf16.mxu1 %v2881_v41 }
  0x64   : > { %960 = vmatmul.mubr.bf16.gmra.mxu0 %v2523_v46 }
  0x65   : > { %1073 = vmatmul.mubr.bf16.gmra.mxu1 %v2883_v44  ;;  %969 = vmatprep.mubr.bf16.mxu0 %v2528_v47 }
  0x66   : > { %1082 = vmatprep.mubr.bf16.mxu1 %v2885_v45 }
  0x6c   : > { %970 = vmatmul.mubr.bf16.gmra.mxu0 %v2527_v48 }
  0x6d   : > { %1083 = vmatmul.mubr.bf16.gmra.mxu1 %v2887_v49  ;;  %979 = vmatprep.mubr.bf16.mxu0 %v2532_v50 }
  0x6e   : > { %1092 = vmatprep.mubr.bf16.mxu1 %v2889_v51 }
  0x74   : > { %980 = vmatmul.mubr.bf16.gmra.mxu0 %v2531_v52 }
  0x75   : > { %1093 = vmatmul.mubr.bf16.gmra.mxu1 %v2891_v53  ;;  %989 = vmatprep.mubr.bf16.mxu0 %v2536_v54 }
  0x76   : > { %1102 = vmatprep.mubr.bf16.mxu1 %v2893_v55 }
  0x7c   : > { %990 = vmatmul.mubr.bf16.gmra.mxu0 %v2535_v56 }
  0x7d   : > { %1103 = vmatmul.mubr.bf16.gmra.mxu1 %v2895_v57  ;;  %999 = vmatprep.mubr.bf16.mxu0 %v2540_v58 }
  0x7e   : > { %1112 = vmatprep.mubr.bf16.mxu1 %v2897_v59 }
  0x84   : > { %1000 = vmatmul.mubr.bf16.gmra.mxu0 %v2539_v60 }
  0x85   : > { %1113 = vmatmul.mubr.bf16.gmra.mxu1 %v2899_v61  ;;  %1009 = vmatprep.mubr.bf16.mxu0 %v2544_v62 }
  0x86   : > { %1122 = vmatprep.mubr.bf16.mxu1 %v2901_v63 }
  0x8c   : > { %1010 = vmatmul.mubr.bf16.gmra.mxu0 %v2543_v0 }
  0x8d   : > { %1123 = vmatmul.mubr.bf16.gmra.mxu1 %v2903_v1  ;;  %1197 = vmatprep.mubr.f32.mxu0 %v3039_v2 }
  0x8e   : > { %1342 = vmatprep.mubr.f32.mxu1 %v3039_v2 }
 0x114   : > { %v941_v3 = vpop.f32.mrf.mxu0 }
 0x115   : > { %v1054_v4 = vpop.f32.mrf.mxu1 }
 0x116   : > { %v3456_v5 = vadd.f32 %v1054_v4, %v941_v3  ;;  %v943_v6 = vpop.f32.mrf.mxu0 }
 0x117   : > { %v1056_v7 = vpop.f32.mrf.mxu1 }
 0x118   : > { %v3458_v8 = vadd.f32 %v1056_v7, %v943_v6  ;;  %v945_v9 = vpop.f32.mrf.mxu0 }
 0x119   : > { %v1058_v10 = vpop.f32.mrf.mxu1 }
 0x11a   : > { %v3460_v11 = vadd.f32 %v1058_v10, %v945_v9  ;;  %v947_v12 = vpop.f32.mrf.mxu0 }
 0x11b   : > { %v1060_v13 = vpop.f32.mrf.mxu1 }
 0x11c   : > { %v3462_v14 = vadd.f32 %v1060_v13, %v947_v12  ;;  %v951_v15 = vpop.f32.mrf.mxu0 }
 0x11d   : > { %v1064_v16 = vpop.f32.mrf.mxu1 }
 0x11e   : > { %v3464_v17 = vadd.f32 %v1064_v16, %v951_v15  ;;  %v953_v18 = vpop.f32.mrf.mxu0 }
 0x11f   : > { %v1066_v19 = vpop.f32.mrf.mxu1 }
 0x120   : > { %v3466_v20 = vadd.f32 %v1066_v19, %v953_v18  ;;  %v955_v21 = vpop.f32.mrf.mxu0 }
 0x121   : > { %v1068_v22 = vpop.f32.mrf.mxu1 }
 0x122   : > { %v3468_v23 = vadd.f32 %v1068_v22, %v955_v21  ;;  %v957_v24 = vpop.f32.mrf.mxu0 }
 0x123   : > { %v1070_v25 = vpop.f32.mrf.mxu1 }
 0x124   : > { %v3470_v26 = vadd.f32 %v1070_v25, %v957_v24  ;;  %v961_v27 = vpop.f32.mrf.mxu0 }
 0x125   : > { %v1074_v28 = vpop.f32.mrf.mxu1 }
 0x126   : > { %v3472_v29 = vadd.f32 %v1074_v28, %v961_v27  ;;  %v963_v30 = vpop.f32.mrf.mxu0 }
 0x127   : > { %v1076_v31 = vpop.f32.mrf.mxu1 }
 0x128   : > { %v3474_v32 = vadd.f32 %v1076_v31, %v963_v30  ;;  %v3476_v33 = vpop.f32.mrf.mxu0 }
 0x129   : > { %v3478_v34 = vpop.f32.mrf.mxu1 }
 0x12a   : > { %v3480_v35 = vpop.f32.mrf.mxu0 }
 0x12b   : > { %v3482_v36 = vpop.f32.mrf.mxu1 }
 0x12c   : > { %v3484_v37 = vpop.f32.mrf.mxu0 }
 0x12d   : > { %v3486_v38 = vpop.f32.mrf.mxu1 }
 0x12e   : > { %v3488_v39 = vpop.f32.mrf.mxu0 }
 0x12f   : > { %v3490_v40 = vpop.f32.mrf.mxu1 }
 0x130   : > { %v3492_v41 = vpop.f32.mrf.mxu0 }
 0x131   : > { %v3494_v42 = vpop.f32.mrf.mxu1 }
 0x132   : > { %v3496_v43 = vpop.f32.mrf.mxu0 }
 0x133   : > { %v3498_v44 = vpop.f32.mrf.mxu1 }
 0x134   : > { %v981_v45 = vpop.f32.mrf.mxu0 }
 0x135   : > { %v1094_v46 = vpop.f32.mrf.mxu1 }
 0x136   : > { %v983_v47 = vpop.f32.mrf.mxu0 }
 0x137   : > { %v1096_v48 = vpop.f32.mrf.mxu1 }
 0x138   : > { %v985_v49 = vpop.f32.mrf.mxu0 }
 0x139   : > { %v1098_v50 = vpop.f32.mrf.mxu1 }
 0x13a   : > { %v987_v51 = vpop.f32.mrf.mxu0 }
 0x13b   : > { %v1100_v52 = vpop.f32.mrf.mxu1 }
 0x13c   : > { %v991_v53 = vpop.f32.mrf.mxu0 }
 0x13d   : > { %v1104_v54 = vpop.f32.mrf.mxu1 }
 0x13e   : > { %v993_v55 = vpop.f32.mrf.mxu0 }
 0x13f   : > { %v1106_v56 = vpop.f32.mrf.mxu1 }
 0x140   : > { %v995_v57 = vpop.f32.mrf.mxu0 }
 0x141   : > { %v1108_v58 = vpop.f32.mrf.mxu1 }
 0x142   : > { %v997_v59 = vpop.f32.mrf.mxu0 }
 0x143   : > { %v1110_v60 = vpop.f32.mrf.mxu1 }
 0x144   : > { %v1001_v61 = vpop.f32.mrf.mxu0  ;;  %v3522_v31 = vadd.f32 %v1110_v60, %v997_v59  ;;  %v3537_v59 = vadd.f32 %v1098_v50, %v985_v49  ;;  %v3553_v49 = vadd.f32 %v3494_v42, %v3492_v41  ;;  %v3573_v41 = vadd.f32 %v3478_v34, %v3476_v33  ;;  %v2904_v34 = vld [vmem:[%s4537_s3 + $0x70] ss:$8 sps:$4 sm:$0xff]   ;;  %v2913_v42 = vld [vmem:[%s4537_s3 + $0x40] ss:$8 sps:$4 sm:$0xff]  }
 0x145   : > { %v1114_v62 = vpop.f32.mrf.mxu1  ;;  %v3040_v33 = vmov 1.0   ;;  %v2919_v50 = vld [vmem:[%s4537_s3 + $0x20] ss:$8 sps:$4 sm:$0xff]  }
 0x146   : > { %v1003_v63 = vpop.f32.mrf.mxu0  ;;  %v3519_v30 = vadd.f32 %v1114_v62, %v1001_v61  ;;  %v3534_v61 = vadd.f32 %v1100_v52, %v987_v51  ;;  %v1206_v51 = vlaneseq }
 0x147   : > { %v1116_v0 = vpop.f32.mrf.mxu1 }
 0x148   : > { %v1005_v1 = vpop.f32.mrf.mxu0  ;;  %v3516_v28 = vadd.f32 %v1116_v0, %v1003_v63  ;;  %v3531_v63 = vadd.f32 %v1104_v54, %v991_v53  ;;  %v3548_v53 = vadd.f32 %v3498_v44, %v3496_v43  ;;  %v3568_v43 = vadd.f32 %v3482_v36, %v3480_v35  ;;  %v2906_v35 = vld [vmem:[%s4537_s3 + $0x74] ss:$8 sps:$4 sm:$0xff]   ;;  %v2909_v36 = vld [vmem:[%s4537_s3 + $0x64] ss:$8 sps:$4 sm:$0xff]  }
 0x149   : > { %v1118_v3 = vpop.f32.mrf.mxu1  ;;  %v2918_v44 = vld [vmem:[%s4537_s3 + $0x34] ss:$8 sps:$4 sm:$0xff]   ;;  %v3625_v52 = vshrl.u32 %v1206_v51, 7 }
 0x14a   : > { %v1007_v4 = vpop.f32.mrf.mxu0  ;;  %v3513_v27 = vadd.f32 %v1118_v3, %v1005_v1  ;;  %v3528_v1 = vadd.f32 %v1106_v56, %v993_v55  ;;  %v3543_v55 = vadd.f32 %v1094_v46, %v981_v45  ;;  %v3563_v45 = vadd.f32 %v3486_v38, %v3484_v37  ;;  %v2907_v37 = vld [vmem:[%s4537_s3 + $0x60] ss:$8 sps:$4 sm:$0xff]   ;;  %v2912_v38 = vld [vmem:[%s4537_s3 + $0x54] ss:$8 sps:$4 sm:$0xff]   ;;  %v2916_v46 = vld [vmem:[%s4537_s3 + $0x30] ss:$8 sps:$4 sm:$0xff]  }
 0x14b   : > { %v1120_v6 = vpop.f32.mrf.mxu1  ;;  %v3628_v54 = vsub.s32 0, %v3625_v52 }
 0x14c   : > { %v1011_v7 = vpop.f32.mrf.mxu0  ;;  %v3510_v25 = vadd.f32 %v1120_v6, %v1007_v4  ;;  %v3525_v4 = vadd.f32 %v1108_v58, %v995_v57  ;;  %v3540_v57 = vadd.f32 %v1096_v48, %v983_v47  ;;  %v3558_v47 = vadd.f32 %v3490_v40, %v3488_v39  ;;  %v2910_v39 = vld [vmem:[%s4537_s3 + $0x50] ss:$8 sps:$4 sm:$0xff]   ;;  %v2915_v40 = vld [vmem:[%s4537_s3 + $0x44] ss:$8 sps:$4 sm:$0xff]  }
 0x14d   : > { %v1124_v9 = vpop.f32.mrf.mxu1  ;;  %v2921_v48 = vld [vmem:[%s4537_s3 + $0x24] ss:$8 sps:$4 sm:$0xff]  }
 0x14e   : > { %v1013_v10 = vpop.f32.mrf.mxu0  ;;  %v3507_v24 = vadd.f32 %v1124_v9, %v1011_v7 }
 0x14f   : > { %v1126_v12 = vpop.f32.mrf.mxu1 }
 0x150   : > { %v1015_v13 = vpop.f32.mrf.mxu0  ;;  %v3504_v22 = vadd.f32 %v1126_v12, %v1013_v10 }
 0x151   : > { %v1128_v15 = vpop.f32.mrf.mxu1 }
 0x152   : > { %v1017_v16 = vpop.f32.mrf.mxu0  ;;  %v3502_v21 = vadd.f32 %v1128_v15, %v1015_v13 }
 0x153   : > { %v1130_v18 = vpop.f32.mrf.mxu1 }
 0x154   : > { %v3500_v19 = vadd.f32 %v1130_v18, %v1017_v16 }
 0x156   : > { %1133 = vmatprep.subr.mxu0 %v3500_v19 }
 0x157   : > { %1134 = vmatpush1.msra.mxu0 %v3502_v21 }
 0x158   : > { %1135 = vmatprep.subr.mxu0 %v3504_v22 }
 0x159   : > { %1136 = vmatpush1.msra.mxu0 %v3507_v24 }
 0x15a   : > { %1137 = vmatprep.subr.mxu0 %v3510_v25 }
 0x15b   : > { %1138 = vmatpush1.msra.mxu0 %v3513_v27 }
 0x15c   : > { %1139 = vmatprep.subr.mxu0 %v3516_v28 }
 0x15d   : > { %1140 = vmatpush1.msra.mxu0 %v3519_v30 }
 0x15e   : > { %1141 = vmatprep.subr.mxu0 %v3522_v31 }
 0x15f   : > { %1142 = vmatpush1.msra.mxu0 %v3525_v4 }
 0x160   : > { %1143 = vmatprep.subr.mxu0 %v3528_v1 }
 0x161   : > { %1144 = vmatpush1.msra.mxu0 %v3531_v63 }
 0x162   : > { %1145 = vmatprep.subr.mxu0 %v3534_v61 }
 0x163   : > { %1146 = vmatpush1.msra.mxu0 %v3537_v59 }
 0x164   : > { %1147 = vmatprep.subr.mxu0 %v3540_v57 }
 0x165   : > { %1148 = vmatpush1.msra.mxu0 %v3543_v55 }
 0x166   : > { %1149 = vmatprep.subr.mxu0 %v3548_v53 }
 0x167   : > { %1150 = vmatpush1.msra.mxu0 %v3553_v49 }
 0x168   : > { %1151 = vmatprep.subr.mxu0 %v3558_v47 }
 0x169   : > { %1152 = vmatpush1.msra.mxu0 %v3563_v45 }
 0x16a   : > { %1153 = vmatprep.subr.mxu0 %v3568_v43 }
 0x16b   : > { %1154 = vmatpush1.msra.mxu0 %v3573_v41 }
 0x16c   : > { %1155 = vmatprep.subr.mxu0 %v3474_v32 }
 0x16d   : > { %1156 = vmatpush1.msra.mxu0 %v3472_v29 }
 0x16e   : > { %1157 = vmatprep.subr.mxu0 %v3470_v26 }
 0x16f   : > { %1158 = vmatpush1.msra.mxu0 %v3468_v23 }
 0x170   : > { %1159 = vmatprep.subr.mxu0 %v3466_v20 }
 0x171   : > { %1160 = vmatpush1.msra.mxu0 %v3464_v17 }
 0x172   : > { %1161 = vmatprep.subr.mxu0 %v3462_v14 }
 0x173   : > { %1162 = vmatpush1.msra.mxu0 %v3460_v11 }
 0x174   : > { %1163 = vmatprep.subr.mxu0 %v3458_v8 }
 0x175   : > { %1164 = vmatpush1.msra.mxu0 %v3456_v5 }
 0x176   : > { %1198 = vmatmul.mubr.f32.vlgmr.msra.gmra.mxu0 %v3040_v33  ;;  %1700 = vmatprep.subr.bf16.mxu0 %v2906_v35 }
 0x177   : > { %1701 = vmatpush1.bf16.msra.mxu0 %v2904_v34 }
 0x178   : > { %1702 = vmatprep.subr.bf16.mxu0 %v2909_v36 }
 0x17b   : > { %1703 = vmatpush1.bf16.msra.mxu0 %v2907_v37 }
 0x17c   : > { %1704 = vmatprep.subr.bf16.mxu0 %v2912_v38 }
 0x17f   : > { %1705 = vmatpush1.bf16.msra.mxu0 %v2910_v39 }
 0x180   : > { %1706 = vmatprep.subr.bf16.mxu0 %v2915_v40 }
 0x183   : > { %1707 = vmatpush1.bf16.msra.mxu0 %v2913_v42 }
 0x184   : > { %1708 = vmatprep.subr.bf16.mxu0 %v2918_v44 }
 0x187   : > { %1709 = vmatpush1.bf16.msra.mxu0 %v2916_v46 }
 0x188   : > { %1710 = vmatprep.subr.bf16.mxu0 %v2921_v48 }
 0x18b   : > { %1711 = vmatpush1.bf16.msra.mxu0 %v2919_v50 }
 0x236   : > { %v1199_v56 = vpop.f32.mrf.mxu0 }
 0x237   : > { %v1204_v58 = vmul.f32 0.0078125, %v1199_v56 }
 0x238   : > { %v1201_v60 = vpop.f32.mrf.mxu0 }
 0x239   : > { %v3631_v62 = vrot.slane %v1204_v58, %v3628_v54  ;;  %v1205_v0 = vmul.f32 0.0078125, %v1201_v60 }
 0x23b   : > { %v3634_v3 = vrot.slane %v1205_v0, %v3628_v54  ;;  %v3638_v6 = vsub.f32 %v3502_v21, %v3631_v62  ;;  %v3650_v10 = vsub.f32 %v3507_v24, %v3631_v62  ;;  %v3662_v16 = vsub.f32 %v3513_v27, %v3631_v62 }
 0x23c   : > { %v3698_v35 = vsub.f32 %v3531_v63, %v3631_v62  ;;  %v3710_v37 = vsub.f32 %v3537_v59, %v3631_v62  ;;  %v3722_v39 = vsub.f32 %v3543_v55, %v3631_v62  ;;  %v3734_v42 = vsub.f32 %v3553_v49, %v3631_v62 }
 0x23d   : > { %v3642_v7 = vsub.f32 %v3500_v19, %v3634_v3  ;;  %v3646_v9 = vsub.f32 %v3504_v22, %v3634_v3  ;;  %v3656_v13 = vsub.f32 %v3510_v25, %v3634_v3  ;;  %v1276_v15 = vmul.f32 %v3638_v6, %v3638_v6 }
 0x23e   : > { %v3668_v19 = vsub.f32 %v3516_v28, %v3634_v3  ;;  %v1274_v21 = vmul.f32 %v3650_v10, %v3650_v10  ;;  %v3674_v22 = vsub.f32 %v3519_v30, %v3631_v62  ;;  %v3680_v25 = vsub.f32 %v3522_v31, %v3634_v3 }
 0x23f   : > { %v1277_v12 = vmul.f32 %v3642_v7, %v3642_v7  ;;  %v1275_v18 = vmul.f32 %v3646_v9, %v3646_v9  ;;  %v1273_v24 = vmul.f32 %v3656_v13, %v3656_v13  ;;  %v1272_v27 = vmul.f32 %v3662_v16, %v3662_v16 }
 0x240   : > { %v3686_v28 = vsub.f32 %v3525_v4, %v3631_v62  ;;  %v1271_v30 = vmul.f32 %v3668_v19, %v3668_v19  ;;  %v3692_v34 = vsub.f32 %v3528_v1, %v3634_v3  ;;  %v1270_v31 = vmul.f32 %v3674_v22, %v3674_v22 }
 0x241   : > { %1278 = vmatprep.subr.mxu1 %v1277_v12  ;;  %v1269_v4 = vmul.f32 %v3680_v25, %v3680_v25  ;;  %v3704_v36 = vsub.f32 %v3534_v61, %v3634_v3  ;;  %v3716_v38 = vsub.f32 %v3540_v57, %v3634_v3  ;;  %v1266_v61 = vmul.f32 %v3698_v35, %v3698_v35 }
 0x242   : > { %1279 = vmatpush1.msra.mxu1 %v1276_v15  ;;  %v1268_v1 = vmul.f32 %v3686_v28, %v3686_v28  ;;  %v1267_v63 = vmul.f32 %v3692_v34, %v3692_v34  ;;  %v3728_v40 = vsub.f32 %v3548_v53, %v3634_v3  ;;  %v1264_v57 = vmul.f32 %v3710_v37, %v3710_v37 }
 0x243   : > { %1280 = vmatprep.subr.mxu1 %v1275_v18  ;;  %v1265_v59 = vmul.f32 %v3704_v36, %v3704_v36  ;;  %v1263_v55 = vmul.f32 %v3716_v38, %v3716_v38  ;;  %v3740_v44 = vsub.f32 %v3558_v47, %v3634_v3  ;;  %v1262_v53 = vmul.f32 %v3722_v39, %v3722_v39 }
 0x244   : > { %1281 = vmatpush1.msra.mxu1 %v1274_v21  ;;  %v3746_v46 = vsub.f32 %v3563_v45, %v3631_v62  ;;  %v1261_v49 = vmul.f32 %v3728_v40, %v3728_v40  ;;  %v3752_v48 = vsub.f32 %v3568_v43, %v3634_v3  ;;  %v1260_v47 = vmul.f32 %v3734_v42, %v3734_v42 }
 0x245   : > { %1282 = vmatprep.subr.mxu1 %v1273_v24  ;;  %v3758_v50 = vsub.f32 %v3573_v41, %v3631_v62  ;;  %v1259_v45 = vmul.f32 %v3740_v44, %v3740_v44  ;;  %v3764_v51 = vsub.f32 %v3474_v32, %v3634_v3  ;;  %v3770_v56 = vsub.f32 %v3472_v29, %v3631_v62 }
 0x246   : > { %1283 = vmatpush1.msra.mxu1 %v1272_v27  ;;  %v1258_v43 = vmul.f32 %v3746_v46, %v3746_v46  ;;  %v1257_v41 = vmul.f32 %v3752_v48, %v3752_v48  ;;  %v3776_v58 = vsub.f32 %v3470_v26, %v3634_v3  ;;  %v3782_v60 = vsub.f32 %v3468_v23, %v3631_v62 }
 0x247   : > { %1284 = vmatprep.subr.mxu1 %v1271_v30  ;;  %v1256_v32 = vmul.f32 %v3758_v50, %v3758_v50  ;;  %v1255_v29 = vmul.f32 %v3764_v51, %v3764_v51  ;;  %v3788_v0 = vsub.f32 %v3466_v20, %v3634_v3  ;;  %v1254_v26 = vmul.f32 %v3770_v56, %v3770_v56  ;;  %v2927_v30 = vld [vmem:[%s4537_s3 + $0x4] ss:$8 sps:$4 sm:$0xff]  }
 0x248   : > { %1285 = vmatpush1.msra.mxu1 %v1270_v31  ;;  %v3794_v12 = vsub.f32 %v3464_v17, %v3631_v62  ;;  %v1253_v23 = vmul.f32 %v3776_v58, %v3776_v58  ;;  %v3800_v15 = vsub.f32 %v3462_v14, %v3634_v3  ;;  %v1252_v20 = vmul.f32 %v3782_v60, %v3782_v60  ;;  %v2925_v31 = vld [vmem:[%s4537_s3] ss:$8 sps:$4 sm:$0xff]  }
 0x249   : > { %1286 = vmatprep.subr.mxu1 %v1269_v4  ;;  %v3806_v18 = vsub.f32 %v3460_v11, %v3631_v62  ;;  %v1251_v17 = vmul.f32 %v3788_v0, %v3788_v0  ;;  %v3812_v21 = vsub.f32 %v3458_v8, %v3634_v3  ;;  %v3818_v24 = vsub.f32 %v3456_v5, %v3631_v62  ;;  %v2922_v5 = vld [vmem:[%s4537_s3 + $0x10] ss:$8 sps:$4 sm:$0xff]   ;;  %v2924_v62 = vld [vmem:[%s4537_s3 + $0x14] ss:$8 sps:$4 sm:$0xff]  }
 0x24a   : > { %1287 = vmatpush1.msra.mxu1 %v1268_v1  ;;  %v1250_v14 = vmul.f32 %v3794_v12, %v3794_v12  ;;  %v1249_v11 = vmul.f32 %v3800_v15, %v3800_v15  ;;  %1712 = vmatprep.subr.bf16.mxu0 %v2924_v62  ;;  %v2930_v4 = vld [vmem:[%s4537_s3 + $0xf4] ss:$8 sps:$4 sm:$0xff]   ;;  %v2928_v1 = vld [vmem:[%s4537_s3 + $0xf0] ss:$8 sps:$4 sm:$0xff]  }
 0x24b   : > { %1288 = vmatprep.subr.mxu1 %v1267_v63  ;;  %v1248_v27 = vmul.f32 %v3806_v18, %v3806_v18  ;;  %v1247_v8 = vmul.f32 %v3812_v21, %v3812_v21  ;;  %v1246_v3 = vmul.f32 %v3818_v24, %v3818_v24  ;;  %1713 = vmatpush1.bf16.msra.mxu0 %v2922_v5  ;;  %v2933_v63 = vld [vmem:[%s4537_s3 + $0xe4] ss:$8 sps:$4 sm:$0xff]  }
 0x24c   : > { %1289 = vmatpush1.msra.mxu1 %v1266_v61  ;;  %1714 = vmatprep.subr.bf16.mxu0 %v2927_v30  ;;  %v2931_v61 = vld [vmem:[%s4537_s3 + $0xe0] ss:$8 sps:$4 sm:$0xff]  }
 0x24d   : > { %1290 = vmatprep.subr.mxu1 %v1265_v59  ;;  %v2934_v59 = vld [vmem:[%s4537_s3 + $0xd0] ss:$8 sps:$4 sm:$0xff]  }
 0x24e   : > { %1291 = vmatpush1.msra.mxu1 %v1264_v57  ;;  %v2936_v57 = vld [vmem:[%s4537_s3 + $0xd4] ss:$8 sps:$4 sm:$0xff]  }
 0x24f   : > { %1292 = vmatprep.subr.mxu1 %v1263_v55  ;;  %1715 = vmatpush1.bf16.msra.mxu0 %v2925_v31  ;;  %v2939_v55 = vld [vmem:[%s4537_s3 + $0xc4] ss:$8 sps:$4 sm:$0xff]  }
 0x250   : > { %1293 = vmatpush1.msra.mxu1 %v1262_v53  ;;  %1716 = vmatprep.subr.bf16.mxu0 %v2930_v4  ;;  %v2937_v53 = vld [vmem:[%s4537_s3 + $0xc0] ss:$8 sps:$4 sm:$0xff]  }
 0x251   : > { %1294 = vmatprep.subr.mxu1 %v1261_v49  ;;  %v2942_v49 = vld [vmem:[%s4537_s3 + $0xb4] ss:$8 sps:$4 sm:$0xff]  }
 0x252   : > { %1295 = vmatpush1.msra.mxu1 %v1260_v47  ;;  %v2940_v47 = vld [vmem:[%s4537_s3 + $0xb0] ss:$8 sps:$4 sm:$0xff]  }
 0x253   : > { %1296 = vmatprep.subr.mxu1 %v1259_v45  ;;  %1717 = vmatpush2.bf16.msra.mxu0 %v2928_v1  ;;  %v2945_v45 = vld [vmem:[%s4537_s3 + $0xa4] ss:$8 sps:$4 sm:$0xff]  }
 0x254   : > { %1297 = vmatpush1.msra.mxu1 %v1258_v43  ;;  %1718 = vmatprep.subr.bf16.mxu0 %v2933_v63  ;;  %v2943_v43 = vld [vmem:[%s4537_s3 + $0xa0] ss:$8 sps:$4 sm:$0xff]  }
 0x255   : > { %1298 = vmatprep.subr.mxu1 %v1257_v41  ;;  %v2948_v41 = vld [vmem:[%s4537_s3 + $0x94] ss:$8 sps:$4 sm:$0xff]   ;;  %v323_v63 = vld [vmem:[%s4535_s1] ss:$8 sm:$0x3] }
 0x256   : > { %1299 = vmatpush1.msra.mxu1 %v1256_v32  ;;  %v2946_v32 = vld [vmem:[%s4537_s3 + $0x90] ss:$8 sps:$4 sm:$0xff]  }
 0x257   : > { %1300 = vmatprep.subr.mxu1 %v1255_v29  ;;  %1719 = vmatpush2.bf16.msra.mxu0 %v2931_v61  ;;  %v2951_v29 = vld [vmem:[%s4537_s3 + $0x84] ss:$8 sps:$4 sm:$0xff]  }
 0x258   : > { %1301 = vmatpush1.msra.mxu1 %v1254_v26  ;;  %1720 = vmatprep.subr.bf16.mxu0 %v2936_v57  ;;  %v2949_v26 = vld [vmem:[%s4537_s3 + $0x80] ss:$8 sps:$4 sm:$0xff]  }
 0x259   : > { %1302 = vmatprep.subr.mxu1 %v1253_v23  ;;  %v2512_v57 = vld [vmem:[%s4535_s1 + $0x1] ss:$8 sm:$0x3] }
 0x25a   : > { %1303 = vmatpush1.msra.mxu1 %v1252_v20 }
 0x25b   : > { %1304 = vmatprep.subr.mxu1 %v1251_v17  ;;  %1721 = vmatpush2.bf16.msra.mxu0 %v2934_v59  ;;  %v3899_v59 = vsub.s32 1, %v3625_v52 }
 0x25c   : > { %1305 = vmatpush1.msra.mxu1 %v1250_v14  ;;  %1722 = vmatprep.subr.bf16.mxu0 %v2939_v55 }
 0x25d   : > { %1306 = vmatprep.subr.mxu1 %v1249_v11 }
 0x25e   : > { %1307 = vmatpush1.msra.mxu1 %v1248_v27 }
 0x25f   : > { %1308 = vmatprep.subr.mxu1 %v1247_v8  ;;  %1723 = vmatpush2.bf16.msra.mxu0 %v2937_v53  ;;  %v3041_v8 = vmov 1966171168  }
 0x260   : > { %1309 = vmatpush1.msra.mxu1 %v1246_v3  ;;  %1724 = vmatprep.subr.bf16.mxu0 %v2942_v49  ;;  %v1359_v3 = vunpack.c.l.s4 %v3041_v8 }
 0x261   : > { %1343 = vmatmul.mubr.f32.vlgmr.msra.gmra.mxu1 %v3040_v33 }
 0x262   : > { %2022 = vmatprep.mubr.f32.mxu1 %v3039_v2  ;;  %v1360_v5 = vunpack.c.0.s8 %v1359_v3 }
 0x263   : > { %1725 = vmatpush2.bf16.msra.mxu0 %v2940_v47  ;;  %v3911_v47 = vrot.slane %v2512_v57, %v3628_v54 }
 0x264   : > { %1726 = vmatprep.subr.bf16.mxu0 %v2945_v45  ;;  %v3891_v30 = vsub.s32 %v1360_v5, %v3625_v52  ;;  %v3914_v45 = vrot.slane %v2512_v57, %v3899_v59 }
 0x267   : > { %1727 = vmatpush2.bf16.msra.mxu0 %v2943_v43 }
 0x268   : > { %1728 = vmatprep.subr.bf16.mxu0 %v2948_v41 }
 0x26b   : > { %1729 = vmatpush2.bf16.msra.mxu0 %v2946_v32 }
 0x26c   : > { %1730 = vmatprep.subr.bf16.mxu0 %v2951_v29 }
 0x26f   : > { %1731 = vmatpush2.bf16.msra.mxu0 %v2949_v26 }
 0x321   : > { %v1344_v23 = vpop.f32.mrf.mxu1 }
 0x322   : > { %v1349_v20 = vmul.f32 0.0078125, %v1344_v23 }
 0x323   : > { %v1346_v17 = vpop.f32.mrf.mxu1 }
 0x324   : > { %v1351_v14 = vadd.f32 1e-05, %v1349_v20  ;;  %v1350_v11 = vmul.f32 0.0078125, %v1346_v17 }
 0x326   : > { %v1352_v27 = vadd.f32 1e-05, %v1350_v11  ;;  %2968 = vrsqrt.f32 %v1351_v14 }
 0x328   : > { %2970 = vrsqrt.f32 %v1352_v27 }
 0x333   : > { %v2969_v62 = vpop.eup %2968 }
 0x335   : > { %v2971_v31 = vpop.eup %2970 }
 0x336   : > { %v1357_v4 = vcombine.low %v2969_v62, %v2971_v31 }
 0x338   : > { %v1364_v1 = vrot.slane %v1357_v4, %v3891_v30 }
 0x33a   : > { %v1371_v61 = vrot.slane %v1364_v1, %v3891_v30 }
 0x33c   : > { %v1373_v55 = vmul.f32 %v1371_v61, %v323_v63 }
 0x33e   : > { %v3905_v53 = vrot.slane %v1373_v55, %v3628_v54  ;;  %v3908_v49 = vrot.slane %v1373_v55, %v3899_v59 }
 0x340   : > { %v1386_v52 = vmul.f32 %v3908_v49, %v3812_v21  ;;  %v1388_v43 = vmul.f32 %v3908_v49, %v3800_v15  ;;  %v1385_v41 = vmul.f32 %v3905_v53, %v3818_v24  ;;  %v1387_v32 = vmul.f32 %v3905_v53, %v3806_v18 }
 0x341   : > { %v1390_v29 = vmul.f32 %v3908_v49, %v3788_v0  ;;  %v1392_v26 = vmul.f32 %v3908_v49, %v3776_v58  ;;  %v1389_v18 = vmul.f32 %v3905_v53, %v3794_v12  ;;  %v1391_v0 = vmul.f32 %v3905_v53, %v3782_v60 }
 0x342   : > { %v1429_v23 = vadd.f32 %v3914_v45, %v1386_v52  ;;  %v1431_v20 = vadd.f32 %v3914_v45, %v1388_v43  ;;  %v1428_v21 = vadd.f32 %v3911_v47, %v1385_v41  ;;  %v1430_v15 = vadd.f32 %v3911_v47, %v1387_v32 }
 0x343   : > { %v1433_v17 = vadd.f32 %v3914_v45, %v1390_v29  ;;  %v1435_v24 = vadd.f32 %v3914_v45, %v1392_v26  ;;  %v1394_v31 = vmul.f32 %v3908_v49, %v3764_v51  ;;  %v1396_v4 = vmul.f32 %v3908_v49, %v3752_v48 }
 0x344   : > { %v1461_v14 = vmax.f32 %v1429_v23, 0.0  ;;  %v1463_v58 = vmax.f32 %v1431_v20, 0.0  ;;  %v1460_v11 = vmax.f32 %v1428_v21, 0.0  ;;  %v1462_v27 = vmax.f32 %v1430_v15, 0.0 }
 0x345   : > { %v1465_v8 = vmax.f32 %v1433_v17, 0.0  ;;  %v1467_v3 = vmax.f32 %v1435_v24, 0.0  ;;  %v1432_v1 = vadd.f32 %v3911_v47, %v1389_v18  ;;  %v1434_v12 = vadd.f32 %v3911_v47, %v1391_v0 }
 0x346   : > { %v1493_v5 = vpack.c.bf16 %v1463_v58, %v1461_v14  ;;  %v1492_v62 = vpack.c.bf16 %v1462_v27, %v1460_v11  ;;  %v1437_v63 = vadd.f32 %v3914_v45, %v1394_v31  ;;  %v1439_v61 = vadd.f32 %v3914_v45, %v1396_v4 }
 0x347   : > { %v1495_v60 = vpack.c.bf16 %v1467_v3, %v1465_v8  ;;  %v1464_v57 = vmax.f32 %v1432_v1, 0.0  ;;  %v1466_v55 = vmax.f32 %v1434_v12, 0.0  ;;  %v1393_v51 = vmul.f32 %v3905_v53, %v3770_v56 }
 0x348   : > { %1732 = vmatprep.mubr.bf16.mxu0 %v1493_v5  ;;  %v1395_v48 = vmul.f32 %v3905_v53, %v3758_v50  ;;  %v1469_v52 = vmax.f32 %v1437_v63, 0.0  ;;  %v1471_v43 = vmax.f32 %v1439_v61, 0.0  ;;  %v1398_v41 = vmul.f32 %v3908_v49, %v3740_v44 }
 0x349   : > { %1733 = vmatmul.mubr.bf16.vlgmr.msra.gmra.mxu0 %v1492_v62  ;;  %v1400_v32 = vmul.f32 %v3908_v49, %v3728_v40  ;;  %v1494_v29 = vpack.c.bf16 %v1466_v55, %v1464_v57  ;;  %v1436_v26 = vadd.f32 %v3911_v47, %v1393_v51  ;;  %v1397_v44 = vmul.f32 %v3905_v53, %v3746_v46 }
 0x34a   : > { %1742 = vmatprep.mubr.bf16.mxu0 %v1495_v60  ;;  %v1438_v23 = vadd.f32 %v3911_v47, %v1395_v48  ;;  %v1497_v20 = vpack.c.bf16 %v1471_v43, %v1469_v52  ;;  %v1441_v21 = vadd.f32 %v3914_v45, %v1398_v41  ;;  %v1399_v40 = vmul.f32 %v3905_v53, %v3734_v42 }
 0x34b   : > { %v1443_v56 = vadd.f32 %v3914_v45, %v1400_v32  ;;  %v1468_v50 = vmax.f32 %v1436_v26, 0.0  ;;  %v1402_v18 = vmul.f32 %v3908_v49, %v3716_v38  ;;  %v1404_v0 = vmul.f32 %v3908_v49, %v3704_v36 }
 0x34c   : > { %v1470_v15 = vmax.f32 %v1438_v23, 0.0  ;;  %v1473_v17 = vmax.f32 %v1441_v21, 0.0  ;;  %v1440_v58 = vadd.f32 %v3911_v47, %v1397_v44  ;;  %v1442_v11 = vadd.f32 %v3911_v47, %v1399_v40 }
 0x34d   : > { %v1475_v24 = vmax.f32 %v1443_v56, 0.0  ;;  %v1445_v8 = vadd.f32 %v3914_v45, %v1402_v18  ;;  %v1447_v46 = vadd.f32 %v3914_v45, %v1404_v0  ;;  %v1401_v38 = vmul.f32 %v3905_v53, %v3722_v39 }
 0x34e   : > { %v1496_v14 = vpack.c.bf16 %v1470_v15, %v1468_v50  ;;  %v1472_v42 = vmax.f32 %v1440_v58, 0.0  ;;  %v1474_v3 = vmax.f32 %v1442_v11, 0.0  ;;  %v1403_v36 = vmul.f32 %v3905_v53, %v3710_v37 }
 0x34f   : > { %v1499_v27 = vpack.c.bf16 %v1475_v24, %v1473_v17  ;;  %v1477_v5 = vmax.f32 %v1445_v8, 0.0  ;;  %v1479_v62 = vmax.f32 %v1447_v46, 0.0  ;;  %v1406_v31 = vmul.f32 %v3908_v49, %v3692_v34 }
 0x350   : > { %v1408_v4 = vmul.f32 %v3908_v49, %v3680_v25  ;;  %v1498_v1 = vpack.c.bf16 %v1474_v3, %v1472_v42  ;;  %v1444_v12 = vadd.f32 %v3911_v47, %v1401_v38  ;;  %v1446_v60 = vadd.f32 %v3911_v47, %v1403_v36 }
 0x351   : > { %1743 = vmatmul.mubr.bf16.gmra.mxu0 %v1494_v29  ;;  %v1501_v63 = vpack.c.bf16 %v1479_v62, %v1477_v5  ;;  %v1449_v61 = vadd.f32 %v3914_v45, %v1406_v31  ;;  %v1405_v34 = vmul.f32 %v3905_v53, %v3698_v35  ;;  %v1407_v25 = vmul.f32 %v3905_v53, %v3686_v28 }
 0x352   : > { %1752 = vmatprep.mubr.bf16.mxu0 %v1497_v20  ;;  %v1451_v39 = vadd.f32 %v3914_v45, %v1408_v4  ;;  %v1476_v37 = vmax.f32 %v1444_v12, 0.0  ;;  %v1478_v57 = vmax.f32 %v1446_v60, 0.0  ;;  %v1410_v48 = vmul.f32 %v3908_v49, %v3668_v19 }
 0x353   : > { %v1481_v55 = vmax.f32 %v1449_v61, 0.0  ;;  %v1412_v52 = vmul.f32 %v3908_v49, %v3656_v13  ;;  %v1448_v41 = vadd.f32 %v3911_v47, %v1405_v34  ;;  %v1450_v32 = vadd.f32 %v3911_v47, %v1407_v25 }
 0x354   : > { %v1483_v51 = vmax.f32 %v1451_v39, 0.0  ;;  %v1500_v43 = vpack.c.bf16 %v1478_v57, %v1476_v37  ;;  %v1453_v26 = vadd.f32 %v3914_v45, %v1410_v48  ;;  %v1409_v19 = vmul.f32 %v3905_v53, %v3674_v22 }
 0x355   : > { %v1455_v35 = vadd.f32 %v3914_v45, %v1412_v52  ;;  %v1480_v28 = vmax.f32 %v1448_v41, 0.0  ;;  %v1482_v23 = vmax.f32 %v1450_v32, 0.0  ;;  %v1411_v13 = vmul.f32 %v3905_v53, %v3662_v16 }
 0x356   : > { %v1503_v29 = vpack.c.bf16 %v1483_v51, %v1481_v55  ;;  %v1485_v20 = vmax.f32 %v1453_v26, 0.0  ;;  %v1414_v56 = vmul.f32 %v3908_v49, %v3646_v9  ;;  %v1416_v50 = vmul.f32 %v3908_v49, %v3642_v7 }
 0x357   : > { %v1487_v21 = vmax.f32 %v1455_v35, 0.0  ;;  %v1502_v15 = vpack.c.bf16 %v1482_v23, %v1480_v28  ;;  %v1452_v44 = vadd.f32 %v3911_v47, %v1409_v19  ;;  %v1454_v40 = vadd.f32 %v3911_v47, %v1411_v13 }
 0x358   : > { %v1457_v24 = vadd.f32 %v3914_v45, %v1414_v56  ;;  %v1459_v22 = vadd.f32 %v3914_v45, %v1416_v50  ;;  %v1413_v9 = vmul.f32 %v3905_v53, %v3650_v10  ;;  %v1415_v7 = vmul.f32 %v3905_v53, %v3638_v6 }
 0x359   : > { %1753 = vmatmul.mubr.bf16.gmra.mxu0 %v1496_v14  ;;  %v1505_v17 = vpack.c.bf16 %v1487_v21, %v1485_v20  ;;  %v1484_v16 = vmax.f32 %v1452_v44, 0.0  ;;  %v1486_v18 = vmax.f32 %v1454_v40, 0.0 }
 0x35a   : > { %1762 = vmatprep.mubr.bf16.mxu0 %v1499_v27  ;;  %v1489_v49 = vmax.f32 %v1457_v24, 0.0  ;;  %v1491_v0 = vmax.f32 %v1459_v22, 0.0  ;;  %v1456_v58 = vadd.f32 %v3911_v47, %v1413_v9  ;;  %v1458_v11 = vadd.f32 %v3911_v47, %v1415_v7 }
 0x35b   : > { %v1504_v14 = vpack.c.bf16 %v1486_v18, %v1484_v16 }
 0x35c   : > { %v1507_v27 = vpack.c.bf16 %v1491_v0, %v1489_v49  ;;  %v1488_v45 = vmax.f32 %v1456_v58, 0.0  ;;  %v1490_v8 = vmax.f32 %v1458_v11, 0.0 }
 0x35e   : > { %v1506_v46 = vpack.c.bf16 %v1490_v8, %v1488_v45 }
 0x361   : > { %1763 = vmatmul.mubr.bf16.gmra.mxu0 %v1498_v1 }
 0x362   : > { %1772 = vmatprep.mubr.bf16.mxu0 %v1501_v63 }
 0x369   : > { %1773 = vmatmul.mubr.bf16.gmra.mxu0 %v1500_v43 }
 0x36a   : > { %1782 = vmatprep.mubr.bf16.mxu0 %v1503_v29 }
 0x371   : > { %1783 = vmatmul.mubr.bf16.gmra.mxu0 %v1502_v15 }
 0x372   : > { %1792 = vmatprep.mubr.bf16.mxu0 %v1505_v17 }
 0x379   : > { %1793 = vmatmul.mubr.bf16.gmra.mxu0 %v1504_v14 }
 0x37a   : > { %1802 = vmatprep.mubr.bf16.mxu0 %v1507_v27 }
 0x381   : > { %1803 = vmatmul.mubr.bf16.gmra.mxu0 %v1506_v46 }
 0x382   : > { %1877 = vmatprep.mubr.f32.mxu0 %v3039_v2 }
 0x409   : > { %v4013_v10 = vpop.f32.mrf.mxu0 }
 0x40b   : > { %v4015_v42 = vpop.f32.mrf.mxu0 }
 0x40d   : > { %v4017_v6 = vpop.f32.mrf.mxu0 }
 0x40f   : > { %v4019_v53 = vpop.f32.mrf.mxu0 }
 0x411   : > { %v4021_v3 = vpop.f32.mrf.mxu0 }
 0x413   : > { %v4023_v47 = vpop.f32.mrf.mxu0 }
 0x415   : > { %v4025_v38 = vpop.f32.mrf.mxu0 }
 0x417   : > { %v4027_v36 = vpop.f32.mrf.mxu0 }
 0x419   : > { %v4029_v5 = vpop.f32.mrf.mxu0 }
 0x41b   : > { %v4031_v62 = vpop.f32.mrf.mxu0 }
 0x41d   : > { %v4033_v2 = vpop.f32.mrf.mxu0 }
 0x41f   : > { %v4035_v31 = vpop.f32.mrf.mxu0 }
 0x421   : > { %v4037_v4 = vpop.f32.mrf.mxu0 }
 0x423   : > { %v4039_v1 = vpop.f32.mrf.mxu0 }
 0x425   : > { %v4041_v12 = vpop.f32.mrf.mxu0 }
 0x427   : > { %v4043_v60 = vpop.f32.mrf.mxu0 }
 0x429   : > { %v4045_v63 = vpop.f32.mrf.mxu0 }
 0x42b   : > { %v4047_v61 = vpop.f32.mrf.mxu0 }
 0x42d   : > { %v4049_v39 = vpop.f32.mrf.mxu0 }
 0x42f   : > { %v4051_v37 = vpop.f32.mrf.mxu0 }
 0x431   : > { %v4053_v57 = vpop.f32.mrf.mxu0 }
 0x433   : > { %v4055_v34 = vpop.f32.mrf.mxu0 }
 0x435   : > { %v4057_v25 = vpop.f32.mrf.mxu0 }
 0x437   : > { %v4059_v55 = vpop.f32.mrf.mxu0 }
 0x439   : > { %v1794_v51 = vpop.f32.mrf.mxu0 }
 0x43b   : > { %v1796_v48 = vpop.f32.mrf.mxu0 }
 0x43d   : > { %v1798_v52 = vpop.f32.mrf.mxu0 }
 0x43f   : > { %v1800_v43 = vpop.f32.mrf.mxu0 }
 0x441   : > { %v1804_v41 = vpop.f32.mrf.mxu0 }
 0x443   : > { %v1806_v32 = vpop.f32.mrf.mxu0 }
 0x445   : > { %v1808_v29 = vpop.f32.mrf.mxu0 }
 0x447   : > { %v1810_v26 = vpop.f32.mrf.mxu0 }
 0x448   : > { %1813 = vmatprep.subr.mxu0 %v1810_v26 }
 0x449   : > { %1814 = vmatpush1.msra.mxu0 %v1808_v29 }
 0x44a   : > { %1815 = vmatprep.subr.mxu0 %v1806_v32 }
 0x44b   : > { %1816 = vmatpush1.msra.mxu0 %v1804_v41 }
 0x44c   : > { %1817 = vmatprep.subr.mxu0 %v1800_v43 }
 0x44d   : > { %1818 = vmatpush1.msra.mxu0 %v1798_v52 }
 0x44e   : > { %1819 = vmatprep.subr.mxu0 %v1796_v48 }
 0x44f   : > { %1820 = vmatpush1.msra.mxu0 %v1794_v51 }
 0x450   : > { %1821 = vmatprep.subr.mxu0 %v4059_v55 }
 0x451   : > { %1822 = vmatpush1.msra.mxu0 %v4057_v25 }
 0x452   : > { %1823 = vmatprep.subr.mxu0 %v4055_v34 }
 0x453   : > { %1824 = vmatpush1.msra.mxu0 %v4053_v57 }
 0x454   : > { %1825 = vmatprep.subr.mxu0 %v4051_v37 }
 0x455   : > { %1826 = vmatpush1.msra.mxu0 %v4049_v39 }
 0x456   : > { %1827 = vmatprep.subr.mxu0 %v4047_v61 }
 0x457   : > { %1828 = vmatpush1.msra.mxu0 %v4045_v63 }
 0x458   : > { %1829 = vmatprep.subr.mxu0 %v4043_v60 }
 0x459   : > { %1830 = vmatpush1.msra.mxu0 %v4041_v12 }
 0x45a   : > { %1831 = vmatprep.subr.mxu0 %v4039_v1 }
 0x45b   : > { %1832 = vmatpush1.msra.mxu0 %v4037_v4 }
 0x45c   : > { %1833 = vmatprep.subr.mxu0 %v4035_v31 }
 0x45d   : > { %1834 = vmatpush1.msra.mxu0 %v4033_v2 }
 0x45e   : > { %1835 = vmatprep.subr.mxu0 %v4031_v62 }
 0x45f   : > { %1836 = vmatpush1.msra.mxu0 %v4029_v5 }
 0x460   : > { %1837 = vmatprep.subr.mxu0 %v4027_v36 }
 0x461   : > { %1838 = vmatpush1.msra.mxu0 %v4025_v38 }
 0x462   : > { %1839 = vmatprep.subr.mxu0 %v4023_v47 }
 0x463   : > { %1840 = vmatpush1.msra.mxu0 %v4021_v3 }
 0x464   : > { %1841 = vmatprep.subr.mxu0 %v4019_v53 }
 0x465   : > { %1842 = vmatpush1.msra.mxu0 %v4017_v6 }
 0x466   : > { %1843 = vmatprep.subr.mxu0 %v4015_v42 }
 0x467   : > { %1844 = vmatpush1.msra.mxu0 %v4013_v10 }
 0x468   : > { %1878 = vmatmul.mubr.f32.vlgmr.msra.gmra.mxu0 %v3040_v33 }
 0x528   : > { %v1879_v35 = vpop.f32.mrf.mxu0 }
 0x529   : > { %v1884_v28 = vmul.f32 0.0078125, %v1879_v35 }
 0x52a   : > { %v1881_v23 = vpop.f32.mrf.mxu0 }
 0x52b   : > { %v4087_v19 = vrot.slane %v1884_v28, %v3628_v54  ;;  %v1885_v13 = vmul.f32 0.0078125, %v1881_v23 }
 0x52d   : > { %v4090_v20 = vrot.slane %v1885_v13, %v3628_v54  ;;  %v4093_v21 = vsub.f32 %v1808_v29, %v4087_v19  ;;  %v4102_v15 = vsub.f32 %v1804_v41, %v4087_v19  ;;  %v4112_v24 = vsub.f32 %v1798_v52, %v4087_v19 }
 0x52e   : > { %v4122_v9 = vsub.f32 %v1794_v51, %v4087_v19  ;;  %v4134_v14 = vsub.f32 %v4057_v25, %v4087_v19  ;;  %v4146_v45 = vsub.f32 %v4053_v57, %v4087_v19  ;;  %v4158_v25 = vsub.f32 %v4049_v39, %v4087_v19 }
 0x52f   : > { %v4096_v56 = vsub.f32 %v1810_v26, %v4090_v20  ;;  %v4099_v50 = vsub.f32 %v1806_v32, %v4090_v20  ;;  %v4107_v40 = vsub.f32 %v1800_v43, %v4090_v20  ;;  %v1956_v17 = vmul.f32 %v4093_v21, %v4093_v21 }
 0x530   : > { %v4117_v16 = vsub.f32 %v1796_v48, %v4090_v20  ;;  %v1954_v18 = vmul.f32 %v4102_v15, %v4102_v15  ;;  %v4128_v49 = vsub.f32 %v4059_v55, %v4090_v20  ;;  %v1952_v0 = vmul.f32 %v4112_v24, %v4112_v24 }
 0x531   : > { %v1957_v44 = vmul.f32 %v4096_v56, %v4096_v56  ;;  %v1955_v22 = vmul.f32 %v4099_v50, %v4099_v50  ;;  %v1953_v7 = vmul.f32 %v4107_v40, %v4107_v40  ;;  %v4140_v11 = vsub.f32 %v4055_v34, %v4090_v20 }
 0x532   : > { %v1951_v58 = vmul.f32 %v4117_v16, %v4117_v16  ;;  %v1950_v27 = vmul.f32 %v4122_v9, %v4122_v9  ;;  %v1949_v8 = vmul.f32 %v4128_v49, %v4128_v49  ;;  %v4152_v46 = vsub.f32 %v4051_v37, %v4090_v20 }
 0x533   : > { %1958 = vmatprep.subr.mxu1 %v1957_v44  ;;  %v1948_v34 = vmul.f32 %v4134_v14, %v4134_v14  ;;  %v1947_v57 = vmul.f32 %v4140_v11, %v4140_v11  ;;  %v4164_v55 = vsub.f32 %v4047_v61, %v4090_v20  ;;  %v1946_v37 = vmul.f32 %v4146_v45, %v4146_v45 }
 0x534   : > { %1959 = vmatpush1.msra.mxu1 %v1956_v17  ;;  %v4170_v51 = vsub.f32 %v4045_v63, %v4087_v19  ;;  %v1945_v39 = vmul.f32 %v4152_v46, %v4152_v46  ;;  %v4176_v48 = vsub.f32 %v4043_v60, %v4090_v20  ;;  %v1944_v61 = vmul.f32 %v4158_v25, %v4158_v25 }
 0x535   : > { %1960 = vmatprep.subr.mxu1 %v1955_v22  ;;  %v4182_v52 = vsub.f32 %v4041_v12, %v4087_v19  ;;  %v1943_v63 = vmul.f32 %v4164_v55, %v4164_v55  ;;  %v4188_v43 = vsub.f32 %v4039_v1, %v4090_v20  ;;  %v4194_v41 = vsub.f32 %v4037_v4, %v4087_v19 }
 0x536   : > { %1961 = vmatpush1.msra.mxu1 %v1954_v18  ;;  %v1942_v60 = vmul.f32 %v4170_v51, %v4170_v51  ;;  %v1941_v12 = vmul.f32 %v4176_v48, %v4176_v48  ;;  %v4200_v32 = vsub.f32 %v4035_v31, %v4090_v20  ;;  %v4206_v29 = vsub.f32 %v4033_v2, %v4087_v19 }
 0x537   : > { %1962 = vmatprep.subr.mxu1 %v1953_v7  ;;  %v1940_v1 = vmul.f32 %v4182_v52, %v4182_v52  ;;  %v1939_v4 = vmul.f32 %v4188_v43, %v4188_v43  ;;  %v4212_v26 = vsub.f32 %v4031_v62, %v4090_v20  ;;  %v1938_v31 = vmul.f32 %v4194_v41, %v4194_v41 }
 0x538   : > { %1963 = vmatpush1.msra.mxu1 %v1952_v0  ;;  %v4218_v35 = vsub.f32 %v4029_v5, %v4087_v19  ;;  %v1937_v2 = vmul.f32 %v4200_v32, %v4200_v32  ;;  %v4224_v28 = vsub.f32 %v4027_v36, %v4090_v20  ;;  %v1936_v62 = vmul.f32 %v4206_v29, %v4206_v29 }
 0x539   : > { %1964 = vmatprep.subr.mxu1 %v1951_v58  ;;  %v4230_v23 = vsub.f32 %v4025_v38, %v4087_v19  ;;  %v1935_v5 = vmul.f32 %v4212_v26, %v4212_v26  ;;  %v4236_v13 = vsub.f32 %v4023_v47, %v4090_v20  ;;  %v4242_v44 = vsub.f32 %v4021_v3, %v4087_v19  ;;  %v2954_v58 = vld [vmem:[%s4538_s4 + $0x70] sm:$0xff]  }
 0x53a   : > { %1965 = vmatpush1.msra.mxu1 %v1950_v27  ;;  %v1934_v36 = vmul.f32 %v4218_v35, %v4218_v35  ;;  %v1933_v38 = vmul.f32 %v4224_v28, %v4224_v28  ;;  %v4248_v17 = vsub.f32 %v4019_v53, %v4090_v20  ;;  %v4254_v22 = vsub.f32 %v4017_v6, %v4087_v19  ;;  %v2955_v27 = vld [vmem:[%s4538_s4 + $0x30] sm:$0xff]  }
 0x53b   : > { %1966 = vmatprep.subr.mxu1 %v1949_v8  ;;  %v1932_v47 = vmul.f32 %v4230_v23, %v4230_v23  ;;  %v1931_v3 = vmul.f32 %v4236_v13, %v4236_v13  ;;  %v4260_v18 = vsub.f32 %v4015_v42, %v4090_v20  ;;  %v1930_v53 = vmul.f32 %v4242_v44, %v4242_v44  ;;  %v2957_v8 = vld [vmem:[%s4538_s4 + $0x28] sm:$0xff]  }
 0x53c   : > { %1967 = vmatpush1.msra.mxu1 %v1948_v34  ;;  %v4266_v7 = vsub.f32 %v4013_v10, %v4087_v19  ;;  %v1929_v6 = vmul.f32 %v4248_v17, %v4248_v17  ;;  %v1928_v0 = vmul.f32 %v4254_v22, %v4254_v22  ;;  %v2952_v10 = vld [vmem:[%s4538_s4 + $0x78] sm:$0xff]   ;;  %v2958_v34 = vld [vmem:[%s4538_s4 + $0x60] sm:$0xff]  }
 0x53d   : > { %1968 = vmatprep.subr.mxu1 %v1947_v57  ;;  %v1927_v42 = vmul.f32 %v4260_v18, %v4260_v18  ;;  %v2953_v19 = vld [vmem:[%s4538_s4 + $0x38] sm:$0xff]   ;;  %v2959_v57 = vld [vmem:[%s4538_s4 + $0x20] sm:$0xff]  }
 0x53e   : > { %1969 = vmatpush1.msra.mxu1 %v1946_v37  ;;  %v1926_v20 = vmul.f32 %v4266_v7, %v4266_v7  ;;  %v2960_v37 = vld [vmem:[%s4538_s4 + $0x58] sm:$0xff]  }
 0x53f   : > { %1970 = vmatprep.subr.mxu1 %v1945_v39  ;;  %v2961_v39 = vld [vmem:[%s4538_s4 + $0x18] sm:$0xff]  }
 0x540   : > { %1971 = vmatpush1.msra.mxu1 %v1944_v61  ;;  %v2962_v61 = vld [vmem:[%s4538_s4 + $0x50] sm:$0xff]  }
 0x541   : > { %1972 = vmatprep.subr.mxu1 %v1943_v63  ;;  %v2963_v63 = vld [vmem:[%s4538_s4 + $0x10] sm:$0xff]  }
 0x542   : > { %1973 = vmatpush1.msra.mxu1 %v1942_v60  ;;  %v2964_v60 = vld [vmem:[%s4538_s4 + $0x48] sm:$0xff]  }
 0x543   : > { %1974 = vmatprep.subr.mxu1 %v1941_v12  ;;  %v2965_v12 = vld [vmem:[%s4538_s4 + $0x8] sm:$0xff]  }
 0x544   : > { %1975 = vmatpush1.msra.mxu1 %v1940_v1  ;;  %v2966_v1 = vld [vmem:[%s4538_s4 + $0x40] sm:$0xff]  }
 0x545   : > { %1976 = vmatprep.subr.mxu1 %v1939_v4  ;;  %v2967_v4 = vld [vmem:[%s4538_s4] sm:$0xff]  }
 0x546   : > { %1977 = vmatpush1.msra.mxu1 %v1938_v31 }
 0x547   : > { %1978 = vmatprep.subr.mxu1 %v1937_v2 }
 0x548   : > { %1979 = vmatpush1.msra.mxu1 %v1936_v62 }
 0x549   : > { %1980 = vmatprep.subr.mxu1 %v1935_v5 }
 0x54a   : > { %1981 = vmatpush1.msra.mxu1 %v1934_v36 }
 0x54b   : > { %1982 = vmatprep.subr.mxu1 %v1933_v38 }
 0x54c   : > { %1983 = vmatpush1.msra.mxu1 %v1932_v47 }
 0x54d   : > { %1984 = vmatprep.subr.mxu1 %v1931_v3 }
 0x54e   : > { %1985 = vmatpush1.msra.mxu1 %v1930_v53 }
 0x54f   : > { %1986 = vmatprep.subr.mxu1 %v1929_v6 }
 0x550   : > { %1987 = vmatpush1.msra.mxu1 %v1928_v0  ;;  %v2513_v0 = vld [vmem:[%s4535_s1 + $0x2] ss:$8 sm:$0x3] }
 0x551   : > { %1988 = vmatprep.subr.mxu1 %v1927_v42 }
 0x552   : > { %1989 = vmatpush1.msra.mxu1 %v1926_v20  ;;  %v2514_v20 = vld [vmem:[%s4535_s1 + $0x3] ss:$8 sm:$0x3] }
 0x553   : > { %2023 = vmatmul.mubr.f32.vlgmr.msra.gmra.mxu1 %v3040_v33  ;;  %2666 = vmatprep.subr.bf16.mxu1 %v2952_v10  ;;  %v2956_v33 = vld [vmem:[%s4538_s4 + $0x68] sm:$0xff]  }
 0x554   : > { %2667 = vmatpush3.bf16.msra.mxu1 %v2953_v19  ;;  %v4334_v19 = vrot.slane %v2514_v20, %v3628_v54 }
 0x555   : > { %2668 = vmatprep.subr.bf16.mxu1 %v2954_v58  ;;  %v4337_v58 = vrot.slane %v2514_v20, %v3899_v59 }
 0x558   : > { %2669 = vmatpush3.bf16.msra.mxu1 %v2955_v27 }
 0x559   : > { %2670 = vmatprep.subr.bf16.mxu1 %v2956_v33 }
 0x55c   : > { %2671 = vmatpush3.bf16.msra.mxu1 %v2957_v8 }
 0x55d   : > { %2672 = vmatprep.subr.bf16.mxu1 %v2958_v34 }
 0x560   : > { %2673 = vmatpush3.bf16.msra.mxu1 %v2959_v57 }
 0x561   : > { %2674 = vmatprep.subr.bf16.mxu1 %v2960_v37 }
 0x564   : > { %2675 = vmatpush3.bf16.msra.mxu1 %v2961_v39 }
 0x565   : > { %2676 = vmatprep.subr.bf16.mxu1 %v2962_v61 }
 0x568   : > { %2677 = vmatpush3.bf16.msra.mxu1 %v2963_v63 }
 0x569   : > { %2678 = vmatprep.subr.bf16.mxu1 %v2964_v60 }
 0x56c   : > { %2679 = vmatpush3.bf16.msra.mxu1 %v2965_v12 }
 0x56d   : > { %2680 = vmatprep.subr.bf16.mxu1 %v2966_v1 }
 0x570   : > { %2681 = vmatpush3.bf16.msra.mxu1 %v2967_v4 }
 0x613   : > { %v2024_v31 = vpop.f32.mrf.mxu1 }
 0x614   : > { %v2029_v2 = vmul.f32 0.0078125, %v2024_v31 }
 0x615   : > { %v2026_v62 = vpop.f32.mrf.mxu1 }
 0x616   : > { %v2031_v5 = vadd.f32 1e-05, %v2029_v2  ;;  %v2030_v36 = vmul.f32 0.0078125, %v2026_v62 }
 0x618   : > { %v2032_v38 = vadd.f32 1e-05, %v2030_v36  ;;  %2972 = vrsqrt.f32 %v2031_v5 }
 0x61a   : > { %2974 = vrsqrt.f32 %v2032_v38 }
 0x625   : > { %v2973_v47 = vpop.eup %2972 }
 0x627   : > { %v2975_v3 = vpop.eup %2974 }
 0x628   : > { %v2037_v53 = vcombine.low %v2973_v47, %v2975_v3 }
 0x62a   : > { %v2044_v6 = vrot.slane %v2037_v53, %v3891_v30 }
 0x62c   : > { %v2051_v42 = vrot.slane %v2044_v6, %v3891_v30 }
 0x62e   : > { %v2053_v10 = vmul.f32 %v2513_v0, %v2051_v42 }
 0x630   : > { %v4340_v27 = vrot.slane %v2053_v10, %v3628_v54  ;;  %v4343_v33 = vrot.slane %v2053_v10, %v3899_v59 }
 0x632   : > { %v2066_v30 = vmul.f32 %v4343_v33, %v4260_v18  ;;  %v2068_v8 = vmul.f32 %v4343_v33, %v4248_v17  ;;  %v2065_v34 = vmul.f32 %v4340_v27, %v4266_v7  ;;  %v2067_v57 = vmul.f32 %v4340_v27, %v4254_v22 }
 0x633   : > { %v2070_v37 = vmul.f32 %v4343_v33, %v4236_v13  ;;  %v2072_v54 = vmul.f32 %v4343_v33, %v4224_v28  ;;  %v2069_v22 = vmul.f32 %v4340_v27, %v4242_v44  ;;  %v2071_v13 = vmul.f32 %v4340_v27, %v4230_v23 }
 0x634   : > { %v2109_v59 = vadd.f32 %v4337_v58, %v2066_v30  ;;  %v2111_v39 = vadd.f32 %v4337_v58, %v2068_v8  ;;  %v2108_v18 = vadd.f32 %v4334_v19, %v2065_v34  ;;  %v2110_v17 = vadd.f32 %v4334_v19, %v2067_v57 }
 0x635   : > { %v2113_v61 = vadd.f32 %v4337_v58, %v2070_v37  ;;  %v2115_v7 = vadd.f32 %v4337_v58, %v2072_v54  ;;  %v2074_v62 = vmul.f32 %v4343_v33, %v4212_v26  ;;  %v2076_v5 = vmul.f32 %v4343_v33, %v4200_v32 }
 0x636   : > { %v2141_v63 = vmax.f32 %v2109_v59, 0.0  ;;  %v2143_v28 = vmax.f32 %v2111_v39, 0.0  ;;  %v2140_v60 = vmax.f32 %v2108_v18, 0.0  ;;  %v2142_v12 = vmax.f32 %v2110_v17, 0.0 }
 0x637   : > { %v2145_v1 = vmax.f32 %v2113_v61, 0.0  ;;  %v2147_v4 = vmax.f32 %v2115_v7, 0.0  ;;  %v2112_v36 = vadd.f32 %v4334_v19, %v2069_v22  ;;  %v2114_v44 = vadd.f32 %v4334_v19, %v2071_v13 }
 0x638   : > { %v2173_v31 = vpack.c.bf16 %v2143_v28, %v2141_v63  ;;  %v2172_v2 = vpack.c.bf16 %v2142_v12, %v2140_v60  ;;  %v2117_v38 = vadd.f32 %v4337_v58, %v2074_v62  ;;  %v2119_v47 = vadd.f32 %v4337_v58, %v2076_v5 }
 0x639   : > { %v2175_v23 = vpack.c.bf16 %v2147_v4, %v2145_v1  ;;  %v2144_v3 = vmax.f32 %v2112_v36, 0.0  ;;  %v2146_v53 = vmax.f32 %v2114_v44, 0.0  ;;  %v2073_v26 = vmul.f32 %v4340_v27, %v4218_v35 }
 0x63a   : > { %2348 = vmatprep.mubr.bf16.mxu1 %v2173_v31  ;;  %v2075_v32 = vmul.f32 %v4340_v27, %v4206_v29  ;;  %v2149_v6 = vmax.f32 %v2117_v38, 0.0  ;;  %v2151_v0 = vmax.f32 %v2119_v47, 0.0  ;;  %v2078_v42 = vmul.f32 %v4343_v33, %v4188_v43 }
 0x63b   : > { %2349 = vmatmul.mubr.bf16.vlgmr.msra.gmra.mxu1 %v2172_v2  ;;  %v2080_v20 = vmul.f32 %v4343_v33, %v4176_v48  ;;  %v2174_v10 = vpack.c.bf16 %v2146_v53, %v2144_v3  ;;  %v2116_v30 = vadd.f32 %v4334_v19, %v2073_v26  ;;  %v2077_v43 = vmul.f32 %v4340_v27, %v4194_v41 }
 0x63c   : > { %2356 = vmatprep.mubr.bf16.mxu1 %v2175_v23  ;;  %v2118_v8 = vadd.f32 %v4334_v19, %v2075_v32  ;;  %v2177_v34 = vpack.c.bf16 %v2151_v0, %v2149_v6  ;;  %v2121_v57 = vadd.f32 %v4337_v58, %v2078_v42  ;;  %v2079_v48 = vmul.f32 %v4340_v27, %v4182_v52 }
 0x63d   : > { %v2123_v35 = vadd.f32 %v4337_v58, %v2080_v20  ;;  %v2148_v29 = vmax.f32 %v2116_v30, 0.0  ;;  %v2082_v39 = vmul.f32 %v4343_v33, %v4164_v55  ;;  %v2084_v18 = vmul.f32 %v4343_v33, %v4152_v46 }
 0x63e   : > { %v2150_v37 = vmax.f32 %v2118_v8, 0.0  ;;  %v2153_v54 = vmax.f32 %v2121_v57, 0.0  ;;  %v2120_v61 = vadd.f32 %v4334_v19, %v2077_v43  ;;  %v2122_v7 = vadd.f32 %v4334_v19, %v2079_v48 }
 0x63f   : > { %v2155_v59 = vmax.f32 %v2123_v35, 0.0  ;;  %v2125_v13 = vadd.f32 %v4337_v58, %v2082_v39  ;;  %v2127_v41 = vadd.f32 %v4337_v58, %v2084_v18  ;;  %v2081_v55 = vmul.f32 %v4340_v27, %v4170_v51 }
 0x640   : > { %v2176_v17 = vpack.c.bf16 %v2150_v37, %v2148_v29  ;;  %v2152_v52 = vmax.f32 %v2120_v61, 0.0  ;;  %v2154_v63 = vmax.f32 %v2122_v7, 0.0  ;;  %v2083_v46 = vmul.f32 %v4340_v27, %v4158_v25 }
 0x641   : > { %v2179_v22 = vpack.c.bf16 %v2155_v59, %v2153_v54  ;;  %v2157_v28 = vmax.f32 %v2125_v13, 0.0  ;;  %v2159_v60 = vmax.f32 %v2127_v41, 0.0  ;;  %v2086_v12 = vmul.f32 %v4343_v33, %v4140_v11 }
 0x642   : > { %v2088_v1 = vmul.f32 %v4343_v33, %v4128_v49  ;;  %v2178_v4 = vpack.c.bf16 %v2154_v63, %v2152_v52  ;;  %v2124_v31 = vadd.f32 %v4334_v19, %v2081_v55  ;;  %v2126_v2 = vadd.f32 %v4334_v19, %v2083_v46 }
 0x643   : > { %2357 = vmatmul.mubr.bf16.gmra.mxu1 %v2174_v10  ;;  %v2181_v62 = vpack.c.bf16 %v2159_v60, %v2157_v28  ;;  %v2129_v5 = vadd.f32 %v4337_v58, %v2086_v12  ;;  %v2085_v11 = vmul.f32 %v4340_v27, %v4146_v45  ;;  %v2087_v49 = vmul.f32 %v4340_v27, %v4134_v14 }
 0x644   : > { %2364 = vmatprep.mubr.bf16.mxu1 %v2177_v34  ;;  %v2131_v51 = vadd.f32 %v4337_v58, %v2088_v1  ;;  %v2156_v25 = vmax.f32 %v2124_v31, 0.0  ;;  %v2158_v36 = vmax.f32 %v2126_v2, 0.0  ;;  %v2090_v38 = vmul.f32 %v4343_v33, %v4117_v16 }
 0x645   : > { %v2161_v44 = vmax.f32 %v2129_v5, 0.0  ;;  %v2092_v47 = vmul.f32 %v4343_v33, %v4107_v40  ;;  %v2128_v53 = vadd.f32 %v4334_v19, %v2085_v11  ;;  %v2130_v26 = vadd.f32 %v4334_v19, %v2087_v49 }
 0x646   : > { %v2163_v23 = vmax.f32 %v2131_v51, 0.0  ;;  %v2180_v3 = vpack.c.bf16 %v2158_v36, %v2156_v25  ;;  %v2133_v6 = vadd.f32 %v4337_v58, %v2090_v38  ;;  %v2089_v16 = vmul.f32 %v4340_v27, %v4122_v9 }
 0x647   : > { %v2135_v45 = vadd.f32 %v4337_v58, %v2092_v47  ;;  %v2160_v14 = vmax.f32 %v2128_v53, 0.0  ;;  %v2162_v0 = vmax.f32 %v2130_v26, 0.0  ;;  %v2091_v40 = vmul.f32 %v4340_v27, %v4112_v24 }
 0x648   : > { %v2183_v32 = vpack.c.bf16 %v2163_v23, %v2161_v44  ;;  %v2165_v42 = vmax.f32 %v2133_v6, 0.0  ;;  %v2094_v10 = vmul.f32 %v4343_v33, %v4099_v50  ;;  %v2096_v30 = vmul.f32 %v4343_v33, %v4096_v56 }
 0x649   : > { %v2167_v20 = vmax.f32 %v2135_v45, 0.0  ;;  %v2182_v8 = vpack.c.bf16 %v2162_v0, %v2160_v14  ;;  %v2132_v34 = vadd.f32 %v4334_v19, %v2089_v16  ;;  %v2134_v57 = vadd.f32 %v4334_v19, %v2091_v40 }
 0x64a   : > { %v2137_v29 = vadd.f32 %v4337_v58, %v2094_v10  ;;  %v2139_v9 = vadd.f32 %v4337_v58, %v2096_v30  ;;  %v2093_v50 = vmul.f32 %v4340_v27, %v4102_v15  ;;  %v2095_v56 = vmul.f32 %v4340_v27, %v4093_v21  ;;  %v4447_v21 = vld [vmem:[%s4535_s1 + $0x4] ss:$0 sm:$0xff] }
 0x64b   : > { %2365 = vmatmul.mubr.bf16.gmra.mxu1 %v2176_v17  ;;  %v2185_v35 = vpack.c.bf16 %v2167_v20, %v2165_v42  ;;  %v2164_v24 = vmax.f32 %v2132_v34, 0.0  ;;  %v2166_v37 = vmax.f32 %v2134_v57, 0.0 }
 0x64c   : > { %2372 = vmatprep.mubr.bf16.mxu1 %v2179_v22  ;;  %v2169_v33 = vmax.f32 %v2137_v29, 0.0  ;;  %v2171_v43 = vmax.f32 %v2139_v9, 0.0  ;;  %v2136_v54 = vadd.f32 %v4334_v19, %v2093_v50  ;;  %v2138_v59 = vadd.f32 %v4334_v19, %v2095_v56 }
 0x64d   : > { %v2184_v48 = vpack.c.bf16 %v2166_v37, %v2164_v24 }
 0x64e   : > { %v2187_v58 = vpack.c.bf16 %v2171_v43, %v2169_v33  ;;  %v2168_v39 = vmax.f32 %v2136_v54, 0.0  ;;  %v2170_v18 = vmax.f32 %v2138_v59, 0.0 }
 0x650   : > { %v2186_v17 = vpack.c.bf16 %v2170_v18, %v2168_v39 }
 0x653   : > { %2373 = vmatmul.mubr.bf16.gmra.mxu1 %v2178_v4 }
 0x654   : > { %2380 = vmatprep.mubr.bf16.mxu1 %v2181_v62 }
 0x65b   : > { %2381 = vmatmul.mubr.bf16.gmra.mxu1 %v2180_v3 }
 0x65c   : > { %2388 = vmatprep.mubr.bf16.mxu1 %v2183_v32 }
 0x663   : > { %2389 = vmatmul.mubr.bf16.gmra.mxu1 %v2182_v8 }
 0x664   : > { %2396 = vmatprep.mubr.bf16.mxu1 %v2185_v35 }
 0x66b   : > { %2397 = vmatmul.mubr.bf16.gmra.mxu1 %v2184_v48 }
 0x66c   : > { %2404 = vmatprep.mubr.bf16.mxu1 %v2187_v58 }
 0x673   : > { %2405 = vmatmul.mubr.bf16.gmra.mxu1 %v2186_v17 }
 0x6fb   : > { %v2682_v15 = vpop.f32.mrf.mxu1 }
 0x6fd   : > { %v2683_v27 = vpop.f32.mrf.mxu1 }
 0x6fe   : > { %v2684_v61 = vadd.f32 %v2683_v27, %v2682_v15 }
 0x6ff   : > { %v2685_v7 = vpop.f32.mrf.mxu1 }
 0x700   : > { %v2351_v19 = vadd.f32 %v2684_v61, %v4447_v21 }
 0x701   : > { %v2686_v22 = vpop.f32.mrf.mxu1 }
 0x702   : > { %2413 = vst [vmem:[%s4450_s8] sm:$0xff] %v2351_v19  ;;  %v2687_v13 = vadd.f32 %v2686_v22, %v2685_v7 }
 0x703   : > { %v2688_v41 = vpop.f32.mrf.mxu1 }
 0x704   : > { %v2354_v52 = vadd.f32 %v2687_v13, %v4447_v21 }
 0x705   : > { %v2689_v63 = vpop.f32.mrf.mxu1 }
 0x706   : > { %2414 = vst [vmem:[%s4450_s8 + $0x8] sm:$0xff] %v2354_v52  ;;  %v2690_v55 = vadd.f32 %v2689_v63, %v2688_v41 }
 0x707   : > { %v2691_v46 = vpop.f32.mrf.mxu1 }
 0x708   : > { %v2359_v28 = vadd.f32 %v2690_v55, %v4447_v21 }
 0x709   : > { %v2692_v60 = vpop.f32.mrf.mxu1 }
 0x70a   : > { %2415 = vst [vmem:[%s4450_s8 + $0x10] sm:$0xff] %v2359_v28  ;;  %v2693_v12 = vadd.f32 %v2692_v60, %v2691_v46 }
 0x70b   : > { %v2694_v1 = vpop.f32.mrf.mxu1 }
 0x70c   : > { %v2362_v4 = vadd.f32 %v2693_v12, %v4447_v21 }
 0x70d   : > { %v2695_v31 = vpop.f32.mrf.mxu1 }
 0x70e   : > { %2416 = vst [vmem:[%s4450_s8 + $0x18] sm:$0xff] %v2362_v4  ;;  %v2696_v2 = vadd.f32 %v2695_v31, %v2694_v1 }
 0x70f   : > { %v2697_v62 = vpop.f32.mrf.mxu1 }
 0x710   : > { %v2367_v5 = vadd.f32 %v2696_v2, %v4447_v21 }
 0x711   : > { %v2698_v51 = vpop.f32.mrf.mxu1 }
 0x712   : > { %2417 = vst [vmem:[%s4450_s8 + $0x20] sm:$0xff] %v2367_v5  ;;  %v2699_v25 = vadd.f32 %v2698_v51, %v2697_v62 }
 0x713   : > { %v2700_v36 = vpop.f32.mrf.mxu1 }
 0x714   : > { %v2370_v11 = vadd.f32 %v2699_v25, %v4447_v21 }
 0x715   : > { %v2701_v49 = vpop.f32.mrf.mxu1 }
 0x716   : > { %2418 = vst [vmem:[%s4450_s8 + $0x28] sm:$0xff] %v2370_v11  ;;  %v2702_v44 = vadd.f32 %v2701_v49, %v2700_v36 }
 0x717   : > { %v2703_v23 = vpop.f32.mrf.mxu1 }
 0x718   : > { %v2375_v38 = vadd.f32 %v2702_v44, %v4447_v21 }
 0x719   : > { %v2704_v47 = vpop.f32.mrf.mxu1 }
 0x71a   : > { %2419 = vst [vmem:[%s4450_s8 + $0x30] sm:$0xff] %v2375_v38  ;;  %v2705_v3 = vadd.f32 %v2704_v47, %v2703_v23 }
 0x71b   : > { %v2706_v53 = vpop.f32.mrf.mxu1 }
 0x71c   : > { %v2378_v26 = vadd.f32 %v2705_v3, %v4447_v21 }
 0x71d   : > { %v2707_v32 = vpop.f32.mrf.mxu1 }
 0x71e   : > { %2420 = vst [vmem:[%s4450_s8 + $0x38] sm:$0xff] %v2378_v26  ;;  %v2708_v6 = vadd.f32 %v2707_v32, %v2706_v53 }
 0x71f   : > { %v2709_v45 = vpop.f32.mrf.mxu1 }
 0x720   : > { %v2383_v14 = vadd.f32 %v2708_v6, %v4447_v21 }
 0x721   : > { %v2710_v0 = vpop.f32.mrf.mxu1 }
 0x722   : > { %2421 = vst [vmem:[%s4450_s8 + $0x40] sm:$0xff] %v2383_v14  ;;  %v2711_v16 = vadd.f32 %v2710_v0, %v2709_v45 }
 0x723   : > { %v2712_v40 = vpop.f32.mrf.mxu1 }
 0x724   : > { %v2386_v42 = vadd.f32 %v2711_v16, %v4447_v21 }
 0x725   : > { %v2713_v20 = vpop.f32.mrf.mxu1 }
 0x726   : > { %2422 = vst [vmem:[%s4450_s8 + $0x48] sm:$0xff] %v2386_v42  ;;  %v2714_v10 = vadd.f32 %v2713_v20, %v2712_v40 }
 0x727   : > { %v2715_v30 = vpop.f32.mrf.mxu1 }
 0x728   : > { %v2391_v8 = vadd.f32 %v2714_v10, %v4447_v21 }
 0x729   : > { %v2716_v34 = vpop.f32.mrf.mxu1 }
 0x72a   : > { %2423 = vst [vmem:[%s4450_s8 + $0x50] sm:$0xff] %v2391_v8  ;;  %v2717_v57 = vadd.f32 %v2716_v34, %v2715_v30 }
 0x72b   : > { %v2718_v35 = vpop.f32.mrf.mxu1 }
 0x72c   : > { %v2394_v29 = vadd.f32 %v2717_v57, %v4447_v21 }
 0x72d   : > { %v2719_v9 = vpop.f32.mrf.mxu1 }
 0x72e   : > { %2424 = vst [vmem:[%s4450_s8 + $0x58] sm:$0xff] %v2394_v29  ;;  %v2720_v24 = vadd.f32 %v2719_v9, %v2718_v35 }
 0x72f   : > { %v2721_v37 = vpop.f32.mrf.mxu1 }
 0x730   : > { %v2399_v50 = vadd.f32 %v2720_v24, %v4447_v21 }
 0x731   : > { %v2722_v56 = vpop.f32.mrf.mxu1 }
 0x732   : > { %2425 = vst [vmem:[%s4450_s8 + $0x60] sm:$0xff] %v2399_v50  ;;  %v2723_v33 = vadd.f32 %v2722_v56, %v2721_v37 }
 0x733   : > { %v2724_v43 = vpop.f32.mrf.mxu1 }
 0x734   : > { %v2402_v48 = vadd.f32 %v2723_v33, %v4447_v21 }
 0x735   : > { %v2725_v54 = vpop.f32.mrf.mxu1 }
 0x736   : > { %2426 = vst [vmem:[%s4450_s8 + $0x68] sm:$0xff] %v2402_v48  ;;  %v2726_v59 = vadd.f32 %v2725_v54, %v2724_v43 }
 0x737   : > { %v2727_v58 = vpop.f32.mrf.mxu1 }
 0x738   : > { %v2407_v39 = vadd.f32 %v2726_v59, %v4447_v21 }
 0x739   : > { %v2728_v18 = vpop.f32.mrf.mxu1 }
 0x73a   : > { %2427 = vst [vmem:[%s4450_s8 + $0x70] sm:$0xff] %v2407_v39  ;;  %v2729_v17 = vadd.f32 %v2728_v18, %v2727_v58 }
 0x73c   : > { %v2410_v15 = vadd.f32 %v2729_v17, %v4447_v21 }
 0x73e   : > { %2428 = vst [vmem:[%s4450_s8 + $0x78] sm:$0xff] %v2410_v15 }
 0x73f   : > { %2989 = shalt.err (!%p2986_p3)
}
 0x740   : > { %s2990_s23 = scalar_lea.hbm %s4486_s12, 2048  ;;  %s2994_s30 = scalar_lea.hbm %s4539_s5, 8192 }
 0x741   : > { %p2991_p4 = scmp.ne.s32.totalorder %s4486_s12, %s2990_s23  ;;  %p2995_p9 = scmp.lt.s32.totalorder %s4486_s12, %s4539_s5 }
 0x742   : > { %p2996_p10 = scmp.lt.s32.totalorder %s2994_s30, %s2990_s23 }
 0x743   : > { %p2992_p7 = pnand %p2991_p4, %p3113_p5 }
 0x744   : > { %p2997_p11 = por %p2996_p10, %p2995_p9 }
 0x745   : > { %p2993_p8 = pneg %p2992_p7 }
 0x747   : > { %p2998_p12 = pnand %p2997_p11, %p2993_p8 }
 0x749   : > { %3001 = shalt.err (!%p2998_p12)
}
 0x74a   : > { %s3043_s8 = smov 128   ;;  %s3044_s9 = smov 8  }
 0x74b   : > { %2730 = dma.vmem_to_hbm [thread:$0]  (%p3113_p5), %s4488_s10, 2048, %s4486_s12, %s4494_s13, %s3043_s8, %s3043_s8, %s3044_s9  }
 0x74c PF: > { %p2736_p13 = scmp.ge.s32.totalorder %s3036_s21, 2  ;;  %s2458_s11 = sand.u32 1, %s3024_s18  }
 0x74d   : > { %s2459_s26 = scalar_lea.sflag [#allocation4], %s2458_s11 }
 0x74e   : > { %p2733_p0 = pnand %p2736_p13, %p3117_p6 }
 0x750   : > { %p2734_p1 = pneg %p2733_p0 }
 0x752   : > { %3019 = dma.done.wait (%p2734_p1), %s2459_s26, 2048  }
 0x753   : > { %3021 = vsyncadd (%p2734_p1), %s2459_s26, 4294965248  ;;  %p15_p2 = scmp.ge.s32.totalorder %s3100_s24, 6   ;;  %s4544_s18 = smov %s3028_s19 }
 0x754   : > { %s4545_s19 = smov %s3032_s20  ;;  %s4546_s20 = smov %s3111_s27 }
 0x755   : > { %s4547_s21 = smov %s3100_s24  ;;  %17 = sbr.rel (!%p15_p2) target bundleno = 3 (0x3), region = 78 }
 0x75a   :  { %2464 = vsyncpa [#allocation4], 1 }
 0x75b   :  { %2466 = vsyncpa [#allocation4 + $0x1], 1 }

</bundles_post_ra>
